<compile_context>
chip_gen: v6e
topology: v6e:2x2x1
jax: 0.10.0
libtpu: 0.0.40
codegen_flags: <defaults>
</compile_context>

<pallas_src>
import functools

import jax
import jax.numpy as jnp
from jax.experimental import pallas as pl
from jax.experimental.pallas import tpu as pltpu

IN_F = 784
H1, H2, N_CLS = 120, 84, 10
LANE = 128   # hidden/logit feature dims padded to one full lane group
C_PAD = 16   # classes padded to a multiple of 8 sublanes for the transposed output


def mlp_kernel(x_ref, w1_ref, b1_ref, w2_ref, b2_ref, w3_ref, b3_ref, o_ref):
    # x arrives as f32 straight from HBM; the bf16 cast happens here (VPU,
    # hidden under the MXU/DMA) so the wrapper never rewrites x through HBM.
    x = x_ref[...].astype(jnp.bfloat16)
    # fc1 + relu (bf16 MXU, f32 accumulate)
    h1 = jnp.dot(x, w1_ref[...], preferred_element_type=jnp.float32)
    h1 = jnp.maximum(h1 + b1_ref[...], 0.0)
    # fc2 + relu
    h2 = jnp.dot(h1.astype(jnp.bfloat16), w2_ref[...],
                 preferred_element_type=jnp.float32)
    h2 = jnp.maximum(h2 + b2_ref[...], 0.0)
    # fc3 — padded-class mask is baked into b3: lanes >= N_CLS hold -1e30.
    logits = jnp.dot(h2.astype(jnp.bfloat16), w3_ref[...],
                     preferred_element_type=jnp.float32) + b3_ref[...]
    # Numerically stable log_softmax over the 10 logical classes
    # (masked lanes underflow exp() to exactly 0).
    m = jnp.max(logits, axis=-1, keepdims=True)
    shifted = logits - m
    lse = jnp.log(jnp.sum(jnp.exp(shifted), axis=-1, keepdims=True))
    lp = shifted - lse                                  # (TB, 128) f32
    # Class-major writeback: XLU transpose + first 16 sublanes ->
    # 64 B of f32 per batch row instead of 512 B.
    o_ref[...] = jnp.transpose(lp)[:C_PAD, :]


def _rup(a, m):
    return -(-a // m) * m


def _pad2(a, rows, cols, value=0.0):
    return jnp.pad(a, ((0, rows - a.shape[0]), (0, cols - a.shape[1])),
                   constant_values=value)


@functools.partial(jax.jit, static_argnames=("tb",))
def mlp_forward(x, w1, b1, w2, b2, w3, b3, *, tb=512):
    B = x.shape[0]
    # Batch tile selection: multiples of 128 rows keep the transposed output
    # lane-dense. Large batches use tb (TB=512 amortizes the ~0.35us/step
    # overhead against a ~1.1us f32 x-tile DMA on v6e); medium batches split
    # into >=2 tiles so the x DMA double-buffers and both v7x TCs get work.
    if B >= 2 * tb:
        TB = tb
    else:
        TB = min(tb, max(LANE, _rup(_rup(B, 2) // 2, LANE)))
    Bp = _rup(B, TB)

    # x stays f32; only pad rows when B is not already a multiple of TB.
    xp = x if Bp == B else _pad2(x, Bp, IN_F)

    # bf16 weights (~0.27 MiB total, VMEM-resident via constant index_maps);
    # biases stay f32 and are added after the f32 accumulation. Padded class
    # lanes of b3 carry -1e30 so no per-tile iota/where mask is needed.
    w1p = _pad2(w1, IN_F, LANE).astype(jnp.bfloat16)
    w2p = _pad2(w2, LANE, LANE).astype(jnp.bfloat16)
    w3p = _pad2(w3, LANE, LANE).astype(jnp.bfloat16)
    b1p = _pad2(b1, 1, LANE).astype(jnp.float32)
    b2p = _pad2(b2, 1, LANE).astype(jnp.float32)
    b3p = _pad2(b3, 1, LANE, value=-1e30).astype(jnp.float32)

    grid = (Bp // TB,)
    resident = lambda shape: pl.BlockSpec(shape, lambda i: (0, 0))

    flops = 2 * Bp * (IN_F * LANE + LANE * LANE + LANE * LANE)
    bytes_accessed = (xp.size * 4
                      + (w1p.size + w2p.size + w3p.size) * 2
                      + (b1p.size + b2p.size + b3p.size) * 4
                      + C_PAD * Bp * 4)

    compiler_args = dict(dimension_semantics=("parallel",))
    if TB > 512:  # only needed if callers push tb to 1024-2048 (e.g. v7x)
        compiler_args["vmem_limit_bytes"] = 64 * 1024 * 1024

    out = pl.pallas_call(
        mlp_kernel,
        out_shape=jax.ShapeDtypeStruct((C_PAD, Bp), jnp.float32),
        grid=grid,
        in_specs=[
            pl.BlockSpec((TB, IN_F), lambda i: (i, 0)),   # x: tiled over batch
            resident((IN_F, LANE)), resident((1, LANE)),  # w1, b1
            resident((LANE, LANE)), resident((1, LANE)),  # w2, b2
            resident((LANE, LANE)), resident((1, LANE)),  # w3, b3
        ],
        out_specs=pl.BlockSpec((C_PAD, TB), lambda i: (0, i)),  # class-major
        compiler_params=pltpu.CompilerParams(**compiler_args),
        cost_estimate=pl.CostEstimate(
            flops=flops,
            transcendentals=Bp * (LANE + 1),
            bytes_accessed=bytes_accessed),
    )(xp, w1p, b1p, w2p, b2p, w3p, b3p)
    # Cheap final fixup: reads only 64 B/row of the class-major block and
    # emits the logical (B, 10) log-probs.
    return out[:N_CLS, :B].T


def init_params(key):
    # Deterministic init mimicking nn.Linear's uniform(-1/sqrt(fan_in), +).
    dims = [(IN_F, H1), (H1, H2), (H2, N_CLS)]
    params = []
    for fan_in, fan_out in dims:
        kw, kb, key = jax.random.split(key, 3)
        bound = 1.0 / jnp.sqrt(jnp.float32(fan_in))
        w = jax.random.uniform(kw, (fan_in, fan_out), jnp.float32, -bound, bound)
        b = jax.random.uniform(kb, (1, fan_out), jnp.float32, -bound, bound)
        params.extend([w, b])
    return params


if __name__ == "__main__":
    key = jax.random.PRNGKey(0)
    kx, kp = jax.random.split(key)
    B = 37  # deliberately not a multiple of 8/16 to exercise the row-padding path
    x = jax.random.normal(kx, (B, IN_F), jnp.float32)
    w1, b1, w2, b2, w3, b3 = init_params(kp)

    out = mlp_forward(x, w1, b1, w2, b2, w3, b3)
    out = jax.block_until_ready(out)
    assert out.shape == (B, N_CLS)

    # Reference with the same bf16-weight / f32-accumulate semantics as the kernel.
    def ref_bf16(x, w1, b1, w2, b2, w3, b3):
        bf = jnp.bfloat16
        h1 = jnp.maximum(jnp.dot(x.astype(bf), w1.astype(bf),
                                 preferred_element_type=jnp.float32) + b1, 0.0)
        h2 = jnp.maximum(jnp.dot(h1.astype(bf), w2.astype(bf),
                                 preferred_element_type=jnp.float32) + b2, 0.0)
        logits = jnp.dot(h2.astype(bf), w3.astype(bf),
                         preferred_element_type=jnp.float32) + b3
        return jax.nn.log_softmax(logits, axis=1)

    ref = ref_bf16(x, w1, b1, w2, b2, w3, b3)
    assert jnp.allclose(out, ref, atol=1e-4, rtol=1e-4)

    # Loose sanity check against the original full-f32 module semantics.
    h1 = jnp.maximum(x @ w1 + b1, 0.0)
    h2 = jnp.maximum(h1 @ w2 + b2, 0.0)
    ref_f32 = jax.nn.log_softmax(h2 @ w3 + b3, axis=1)
    assert jnp.allclose(out, ref_f32, atol=2e-1, rtol=2e-1)

    print("KERNEL_OK")
</pallas_src>

<mosaic_0001>
module attributes {stable_mosaic.version = 11 : i64} {
  func.func @mlp_kernel(%arg0: i32, %arg1: memref<128x784xf32, #tpu.memory_space<vmem>>, %arg2: memref<784x128xbf16, #tpu.memory_space<vmem>>, %arg3: memref<1x128xf32, #tpu.memory_space<vmem>>, %arg4: memref<128x128xbf16, #tpu.memory_space<vmem>>, %arg5: memref<1x128xf32, #tpu.memory_space<vmem>>, %arg6: memref<128x128xbf16, #tpu.memory_space<vmem>>, %arg7: memref<1x128xf32, #tpu.memory_space<vmem>>, %arg8: memref<16x128xf32, #tpu.memory_space<vmem>>) attributes {dimension_semantics = [#tpu.dimension_semantics<parallel>], iteration_bounds = array<i64: 1>, scalar_prefetch = 0 : i64, scratch_operands = 0 : i64, tpu.core_type = #tpu.core_type<tc>, window_params = [{transform_indices = @transform_0, window_bounds = array<i64: 128, 784>}, {pipeline_mode = #tpu.pipeline_mode<synchronous>, transform_indices = @transform_1, window_bounds = array<i64: 784, 128>}, {pipeline_mode = #tpu.pipeline_mode<synchronous>, transform_indices = @transform_2, window_bounds = array<i64: 1, 128>}, {pipeline_mode = #tpu.pipeline_mode<synchronous>, transform_indices = @transform_3, window_bounds = array<i64: 128, 128>}, {pipeline_mode = #tpu.pipeline_mode<synchronous>, transform_indices = @transform_4, window_bounds = array<i64: 1, 128>}, {pipeline_mode = #tpu.pipeline_mode<synchronous>, transform_indices = @transform_5, window_bounds = array<i64: 128, 128>}, {pipeline_mode = #tpu.pipeline_mode<synchronous>, transform_indices = @transform_6, window_bounds = array<i64: 1, 128>}, {transform_indices = @transform_7, window_bounds = array<i64: 16, 128>}]} {
    %c0 = arith.constant 0 : index
    %c0_0 = arith.constant 0 : index
    %0 = vector.load %arg1[%c0, %c0_0] : memref<128x784xf32, #tpu.memory_space<vmem>>, vector<128x784xf32>
    %1 = arith.truncf %0 : vector<128x784xf32> to vector<128x784xbf16>
    %c0_1 = arith.constant 0 : index
    %c0_2 = arith.constant 0 : index
    %2 = vector.load %arg2[%c0_1, %c0_2] : memref<784x128xbf16, #tpu.memory_space<vmem>>, vector<784x128xbf16>
    %cst = arith.constant dense<0.000000e+00> : vector<128x128xf32>
    %3 = tpu.matmul %1, %2, %cst {dimension_numbers = #tpu.dot_dimension_numbers<[1], [0], [0], [1], [0, 0, 1, 1], [], []>} : vector<128x784xbf16>, vector<784x128xbf16>, vector<128x128xf32> -> vector<128x128xf32>
    %c0_3 = arith.constant 0 : index
    %c0_4 = arith.constant 0 : index
    %4 = vector.load %arg3[%c0_3, %c0_4] : memref<1x128xf32, #tpu.memory_space<vmem>>, vector<1x128xf32>
    %5 = vector.broadcast %4 : vector<1x128xf32> to vector<128x128xf32>
    %6 = arith.addf %3, %5 : vector<128x128xf32>
    %cst_5 = arith.constant 0.000000e+00 : f32
    %7 = vector.broadcast %cst_5 : f32 to vector<128x128xf32>
    %8 = arith.maximumf %6, %7 : vector<128x128xf32>
    %9 = arith.truncf %8 : vector<128x128xf32> to vector<128x128xbf16>
    %c0_6 = arith.constant 0 : index
    %c0_7 = arith.constant 0 : index
    %10 = vector.load %arg4[%c0_6, %c0_7] : memref<128x128xbf16, #tpu.memory_space<vmem>>, vector<128x128xbf16>
    %cst_8 = arith.constant dense<0.000000e+00> : vector<128x128xf32>
    %11 = tpu.matmul %9, %10, %cst_8 {dimension_numbers = #tpu.dot_dimension_numbers<[1], [0], [0], [1], [0, 0, 1, 1], [], []>} : vector<128x128xbf16>, vector<128x128xbf16>, vector<128x128xf32> -> vector<128x128xf32>
    %c0_9 = arith.constant 0 : index
    %c0_10 = arith.constant 0 : index
    %12 = vector.load %arg5[%c0_9, %c0_10] : memref<1x128xf32, #tpu.memory_space<vmem>>, vector<1x128xf32>
    %13 = vector.broadcast %12 : vector<1x128xf32> to vector<128x128xf32>
    %14 = arith.addf %11, %13 : vector<128x128xf32>
    %cst_11 = arith.constant 0.000000e+00 : f32
    %15 = vector.broadcast %cst_11 : f32 to vector<128x128xf32>
    %16 = arith.maximumf %14, %15 : vector<128x128xf32>
    %17 = arith.truncf %16 : vector<128x128xf32> to vector<128x128xbf16>
    %c0_12 = arith.constant 0 : index
    %c0_13 = arith.constant 0 : index
    %18 = vector.load %arg6[%c0_12, %c0_13] : memref<128x128xbf16, #tpu.memory_space<vmem>>, vector<128x128xbf16>
    %cst_14 = arith.constant dense<0.000000e+00> : vector<128x128xf32>
    %19 = tpu.matmul %17, %18, %cst_14 {dimension_numbers = #tpu.dot_dimension_numbers<[1], [0], [0], [1], [0, 0, 1, 1], [], []>} : vector<128x128xbf16>, vector<128x128xbf16>, vector<128x128xf32> -> vector<128x128xf32>
    %c0_15 = arith.constant 0 : index
    %c0_16 = arith.constant 0 : index
    %20 = vector.load %arg7[%c0_15, %c0_16] : memref<1x128xf32, #tpu.memory_space<vmem>>, vector<1x128xf32>
    %21 = vector.broadcast %20 : vector<1x128xf32> to vector<128x128xf32>
    %22 = arith.addf %19, %21 : vector<128x128xf32>
    %cst_17 = arith.constant dense<0xFF800000> : vector<128xf32>
    %23 = vector.multi_reduction <maximumf>, %22, %cst_17 [1] : vector<128x128xf32> to vector<128xf32>
    %24 = vector.shape_cast %23 : vector<128xf32> to vector<128x1xf32>
    %25 = vector.broadcast %24 : vector<128x1xf32> to vector<128x128xf32>
    %26 = arith.subf %22, %25 : vector<128x128xf32>
    %27 = math.exp %26 : vector<128x128xf32>
    %cst_18 = arith.constant dense<0.000000e+00> : vector<128xf32>
    %28 = vector.multi_reduction <add>, %27, %cst_18 [1] : vector<128x128xf32> to vector<128xf32>
    %29 = vector.shape_cast %28 : vector<128xf32> to vector<128x1xf32>
    %30 = math.log %29 : vector<128x1xf32>
    %31 = vector.broadcast %30 : vector<128x1xf32> to vector<128x128xf32>
    %32 = arith.subf %26, %31 : vector<128x128xf32>
    %33 = tpu.transpose %32, [1, 0] : vector<128x128xf32> -> vector<128x128xf32>
    %34 = vector.extract_strided_slice %33 {offsets = [0, 0], sizes = [16, 128], strides = [1, 1]} : vector<128x128xf32> to vector<16x128xf32>
    %c0_19 = arith.constant 0 : index
    %c0_20 = arith.constant 0 : index
    %35 = vector.load %arg8[%c0_19, %c0_20] : memref<16x128xf32, #tpu.memory_space<vmem>>, vector<16x128xf32>
    tpu.vector_store %arg8[%c0_19, %c0_20], %34 {strides = array<i32>} : memref<16x128xf32, #tpu.memory_space<vmem>>, vector<16x128xf32>,
    return
  }
  func.func @transform_0(%arg0: i32) -> (i32, i32) {
    %c0_i32 = arith.constant 0 : i32
    %c0_i32_0 = arith.constant 0 : i32
    return %arg0, %c0_i32 : i32, i32
  }
  func.func @transform_1(%arg0: i32) -> (i32, i32) {
    %c0_i32 = arith.constant 0 : i32
    %c0_i32_0 = arith.constant 0 : i32
    %c0_i32_1 = arith.constant 0 : i32
    return %c0_i32, %c0_i32_0 : i32, i32
  }
  func.func @transform_2(%arg0: i32) -> (i32, i32) {
    %c0_i32 = arith.constant 0 : i32
    %c0_i32_0 = arith.constant 0 : i32
    %c0_i32_1 = arith.constant 0 : i32
    return %c0_i32, %c0_i32_0 : i32, i32
  }
  func.func @transform_3(%arg0: i32) -> (i32, i32) {
    %c0_i32 = arith.constant 0 : i32
    %c0_i32_0 = arith.constant 0 : i32
    %c0_i32_1 = arith.constant 0 : i32
    return %c0_i32, %c0_i32_0 : i32, i32
  }
  func.func @transform_4(%arg0: i32) -> (i32, i32) {
    %c0_i32 = arith.constant 0 : i32
    %c0_i32_0 = arith.constant 0 : i32
    %c0_i32_1 = arith.constant 0 : i32
    return %c0_i32, %c0_i32_0 : i32, i32
  }
  func.func @transform_5(%arg0: i32) -> (i32, i32) {
    %c0_i32 = arith.constant 0 : i32
    %c0_i32_0 = arith.constant 0 : i32
    %c0_i32_1 = arith.constant 0 : i32
    return %c0_i32, %c0_i32_0 : i32, i32
  }
  func.func @transform_6(%arg0: i32) -> (i32, i32) {
    %c0_i32 = arith.constant 0 : i32
    %c0_i32_0 = arith.constant 0 : i32
    %c0_i32_1 = arith.constant 0 : i32
    return %c0_i32, %c0_i32_0 : i32, i32
  }
  func.func @transform_7(%arg0: i32) -> (i32, i32) {
    %c0_i32 = arith.constant 0 : i32
    %c0_i32_0 = arith.constant 0 : i32
    return %c0_i32, %arg0 : i32, i32
  }
}

</mosaic_0001>

<bundles_post_ra>
// kernel: mlp_forward.1
= control target key start
LH: loop header
LB: loop body
LE: loop exit
PB: predicated region body
PF: predicated region fallthrough
CT: control target
= control target key end

     0   :  { %vm594_vm0 = vcmask 130048   ;;  %s2960_s1 = inlined_call_operand.vmem [shape: bf16[784,128], index: 1, kind: input, shape index: {}]   ;;  %s2961_s0 = inlined_call_operand.vmem [shape: f32[128,784], index: 0, kind: input, shape index: {}]   ;;  %s2962_s3 = inlined_call_operand.vmem [shape: bf16[128,128], index: 3, kind: input, shape index: {}]   ;;  %s2963_s2 = inlined_call_operand.vmem [shape: f32[1,128], index: 2, kind: input, shape index: {}]   ;;  %s2964_s5 = inlined_call_operand.vmem [shape: bf16[128,128], index: 5, kind: input, shape index: {}]   ;;  %s2965_s4 = inlined_call_operand.vmem [shape: f32[1,128], index: 4, kind: input, shape index: {}]   ;;  %s2966_s6 = inlined_call_operand.vmem [shape: f32[1,128], index: 6, kind: input, shape index: {}]   ;;  %s2967_s7 = inlined_call_operand.vmem [shape: f32[16,128], index: 7, kind: output, shape index: {}]  }
   0x1   :  { %v1996_v0 = vld [vmem:[%s2960_s1 + $0x78] sm:$0xff]   ;;  %v2000_v4 = vld [vmem:[%s2960_s1 + $0x70] sm:$0xff]   ;;  %v2004_v8 = vld [vmem:[%s2960_s1 + $0x68] sm:$0xff]  }
   0x2   :  { %v1997_v1 = vld [vmem:[%s2960_s1 + $0xf8] sm:$0xff]   ;;  %1665 = vmatprep.subr.bf16.mxu0 %v1996_v0  ;;  %v2001_v5 = vld [vmem:[%s2960_s1 + $0xf0] sm:$0xff]   ;;  %v2005_v9 = vld [vmem:[%s2960_s1 + $0xe8] sm:$0xff]  }
   0x3   :  { %v1998_v2 = vld [vmem:[%s2960_s1 + $0x38] sm:$0xff]   ;;  %1729 = vmatprep.subr.bf16.mxu1 %v1997_v1  ;;  %v2002_v6 = vld [vmem:[%s2960_s1 + $0x30] sm:$0xff]   ;;  %v2006_v10 = vld [vmem:[%s2960_s1 + $0x28] sm:$0xff]  }
   0x4   :  { %v1999_v3 = vld [vmem:[%s2960_s1 + $0xb8] sm:$0xff]   ;;  %1666 = vmatpush3.bf16.msra.mxu0 %v1998_v2  ;;  %v2003_v7 = vld [vmem:[%s2960_s1 + $0xb0] sm:$0xff]   ;;  %v2007_v11 = vld [vmem:[%s2960_s1 + $0xa8] sm:$0xff]  }
   0x5   :  { %1730 = vmatpush3.bf16.msra.mxu1 %v1999_v3  ;;  %1667 = vmatprep.subr.bf16.mxu0 %v2000_v4  ;;  %v2008_v12 = vld [vmem:[%s2960_s1 + $0x60] sm:$0xff]   ;;  %v2012_v16 = vld [vmem:[%s2960_s1 + $0x58] sm:$0xff]   ;;  %v2016_v20 = vld [vmem:[%s2960_s1 + $0x50] sm:$0xff]  }
   0x6   :  { %1731 = vmatprep.subr.bf16.mxu1 %v2001_v5  ;;  %v2009_v13 = vld [vmem:[%s2960_s1 + $0xe0] sm:$0xff]   ;;  %v2013_v17 = vld [vmem:[%s2960_s1 + $0xd8] sm:$0xff]   ;;  %v2017_v21 = vld [vmem:[%s2960_s1 + $0xd0] sm:$0xff]  }
   0x7   :  { %v2010_v14 = vld [vmem:[%s2960_s1 + $0x20] sm:$0xff]   ;;  %v2014_v18 = vld [vmem:[%s2960_s1 + $0x18] sm:$0xff]   ;;  %v2018_v22 = vld [vmem:[%s2960_s1 + $0x10] sm:$0xff]  }
   0x8   :  { %1668 = vmatpush3.bf16.msra.mxu0 %v2002_v6  ;;  %v2011_v15 = vld [vmem:[%s2960_s1 + $0xa0] sm:$0xff]   ;;  %v2015_v19 = vld [vmem:[%s2960_s1 + $0x98] sm:$0xff]   ;;  %v2019_v23 = vld [vmem:[%s2960_s1 + $0x90] sm:$0xff]  }
   0x9   :  { %1732 = vmatpush3.bf16.msra.mxu1 %v2003_v7  ;;  %1669 = vmatprep.subr.bf16.mxu0 %v2004_v8  ;;  %v2020_v24 = vld [vmem:[%s2960_s1 + $0x48] sm:$0xff]   ;;  %v2024_v28 = vld [vmem:[%s2960_s1 + $0x40] sm:$0xff]   ;;  %v30_v34 = vld [vmem:[%s2961_s0 + $0x18] sm:$0xff] }
   0xa   :  { %1733 = vmatprep.subr.bf16.mxu1 %v2005_v9  ;;  %v2021_v25 = vld [vmem:[%s2960_s1 + $0xc8] sm:$0xff]   ;;  %v2025_v29 = vld [vmem:[%s2960_s1 + $0xc0] sm:$0xff]   ;;  %v37_v36 = vld [vmem:[%s2961_s0 + $0x50] sm:$0xff] }
   0xb   :  { %v2022_v26 = vld [vmem:[%s2960_s1 + $0x8] sm:$0xff]   ;;  %v2026_v30 = vld [vmem:[%s2960_s1] sm:$0xff]   ;;  %v34_v38 = vld [vmem:[%s2961_s0 + $0x38] sm:$0xff]  ;;  %v142_v39 = vpack.c.bf16 %v37_v36, %v30_v34 }
   0xc   :  { %1670 = vmatpush3.bf16.msra.mxu0 %v2006_v10  ;;  %v2023_v27 = vld [vmem:[%s2960_s1 + $0x88] sm:$0xff]   ;;  %v2027_v31 = vld [vmem:[%s2960_s1 + $0x80] sm:$0xff]   ;;  %v29_v41 = vld [vmem:[%s2961_s0 + $0x10] sm:$0xff] }
   0xd   :  { %1734 = vmatpush3.bf16.msra.mxu1 %v2007_v11  ;;  %1671 = vmatprep.subr.bf16.mxu0 %v2008_v12  ;;  %v28_v32 = vld [vmem:[%s2961_s0 + $0x8] sm:$0xff]  ;;  %v35_v33 = vld [vmem:[%s2961_s0 + $0x40] sm:$0xff]  ;;  %v2028_v44 = vld [vmem:[%s2960_s1 + $0x178] sm:$0xff]  }
   0xe   :  { %1735 = vmatprep.subr.bf16.mxu1 %v2009_v13  ;;  %v140_v35 = vpack.c.bf16 %v35_v33, %v28_v32  ;;  %v27_v37 = vld [vmem:[%s2961_s0] sm:$0xff]  ;;  %v36_v42 = vld [vmem:[%s2961_s0 + $0x48] sm:$0xff]  ;;  %748 = vmatprep.mubr.bf16.mxu1 %v142_v39  ;;  %v2029_v45 = vld [vmem:[%s2960_s1 + $0x138] sm:$0xff]  }
   0xf   :  { %v139_v40 = vpack.c.bf16 %v34_v38, %v27_v37  ;;  %v141_v43 = vpack.c.bf16 %v36_v42, %v29_v41  ;;  %v42_v46 = vld [vmem:[%s2961_s0 + $0x78] sm:$0xff]  ;;  %v49_v47 = vld [vmem:[%s2961_s0 + $0xb0] sm:$0xff]  ;;  %v44_v48 = vld [vmem:[%s2961_s0 + $0x88] sm:$0xff] }
  0x10   :  { %1672 = vmatpush3.bf16.msra.mxu0 %v2010_v14  ;;  %651 = vmatprep.mubr.bf16.mxu0 %v140_v35  ;;  %v51_v49 = vld [vmem:[%s2961_s0 + $0xc0] sm:$0xff]  ;;  %v147_v50 = vpack.c.bf16 %v49_v47, %v42_v46  ;;  %v41_v52 = vld [vmem:[%s2961_s0 + $0x70] sm:$0xff]  ;;  %v48_v53 = vld [vmem:[%s2961_s0 + $0xa8] sm:$0xff] }
  0x11   :  { %1736 = vmatpush3.bf16.msra.mxu1 %v2011_v15  ;;  %1673 = vmatprep.subr.bf16.mxu0 %v2012_v16  ;;  %v149_v51 = vpack.c.bf16 %v51_v49, %v44_v48  ;;  %v43_v54 = vld [vmem:[%s2961_s0 + $0x80] sm:$0xff]  ;;  %v50_v55 = vld [vmem:[%s2961_s0 + $0xb8] sm:$0xff]  ;;  %v146_v56 = vpack.c.bf16 %v48_v53, %v41_v52  ;;  %v2030_v57 = vld [vmem:[%s2960_s1 + $0x170] sm:$0xff]  }
  0x12   :  { %1737 = vmatprep.subr.bf16.mxu1 %v2013_v17  ;;  %v148_v58 = vpack.c.bf16 %v50_v55, %v43_v54  ;;  %v2031_v59 = vld [vmem:[%s2960_s1 + $0x130] sm:$0xff]   ;;  %v56_v60 = vld [vmem:[%s2961_s0 + $0xe8] sm:$0xff]  ;;  %v63_v61 = vld [vmem:[%s2961_s0 + $0x120] sm:$0xff] }
  0x13   :  { %v154_v62 = vpack.c.bf16 %v63_v61, %v56_v60  ;;  %v58_v63 = vld [vmem:[%s2961_s0 + $0xf8] sm:$0xff]  ;;  %v65_v0 = vld [vmem:[%s2961_s0 + $0x130] sm:$0xff]  ;;  %v55_v2 = vld [vmem:[%s2961_s0 + $0xe0] sm:$0xff] }
  0x14   :  { %1674 = vmatpush3.bf16.msra.mxu0 %v2014_v18  ;;  %v156_v1 = vpack.c.bf16 %v65_v0, %v58_v63  ;;  %v62_v3 = vld [vmem:[%s2961_s0 + $0x118] sm:$0xff]  ;;  %v57_v4 = vld [vmem:[%s2961_s0 + $0xf0] sm:$0xff]  ;;  %v2032_v5 = vld [vmem:[%s2960_s1 + $0x168] sm:$0xff]  }
  0x15   :  { %1738 = vmatpush3.bf16.msra.mxu1 %v2015_v19  ;;  %1675 = vmatprep.subr.bf16.mxu0 %v2016_v20  ;;  %v2033_v6 = vld [vmem:[%s2960_s1 + $0x128] sm:$0xff]   ;;  %v70_v8 = vld [vmem:[%s2961_s0 + $0x158] sm:$0xff]  ;;  %v77_v9 = vld [vmem:[%s2961_s0 + $0x190] sm:$0xff]  ;;  %v153_v12 = vpack.c.bf16 %v62_v3, %v55_v2 }
  0x16   :  { %1739 = vmatprep.subr.bf16.mxu1 %v2017_v21  ;;  %v64_v7 = vld [vmem:[%s2961_s0 + $0x128] sm:$0xff]  ;;  %v79_v11 = vld [vmem:[%s2961_s0 + $0x1a0] sm:$0xff]  ;;  %v161_v14 = vpack.c.bf16 %v77_v9, %v70_v8  ;;  %v69_v18 = vld [vmem:[%s2961_s0 + $0x150] sm:$0xff] }
  0x17   :  { %v72_v10 = vld [vmem:[%s2961_s0 + $0x168] sm:$0xff]  ;;  %v155_v13 = vpack.c.bf16 %v64_v7, %v57_v4  ;;  %v2034_v15 = vld [vmem:[%s2960_s1 + $0x160] sm:$0xff]   ;;  %v78_v21 = vld [vmem:[%s2961_s0 + $0x198] sm:$0xff] }
  0x18   :  { %1676 = vmatpush3.bf16.msra.mxu0 %v2018_v22  ;;  %v163_v16 = vpack.c.bf16 %v79_v11, %v72_v10  ;;  %v2035_v17 = vld [vmem:[%s2960_s1 + $0x120] sm:$0xff]   ;;  %v76_v19 = vld [vmem:[%s2961_s0 + $0x188] sm:$0xff]  ;;  %v2038_v32 = vld [vmem:[%s2960_s1 + $0x150] sm:$0xff]  }
  0x19   :  { %1740 = vmatpush3.bf16.msra.mxu1 %v2019_v23  ;;  %1677 = vmatprep.subr.bf16.mxu0 %v2020_v24  ;;  %v71_v20 = vld [vmem:[%s2961_s0 + $0x160] sm:$0xff]  ;;  %v84_v22 = vld [vmem:[%s2961_s0 + $0x1c8] sm:$0xff]  ;;  %v2036_v24 = vld [vmem:[%s2960_s1 + $0x158] sm:$0xff]  }
  0x1a   :  { %1741 = vmatprep.subr.bf16.mxu1 %v2021_v25  ;;  %v91_v23 = vld [vmem:[%s2961_s0 + $0x200] sm:$0xff]  ;;  %v86_v25 = vld [vmem:[%s2961_s0 + $0x1d8] sm:$0xff]  ;;  %v2039_v33 = vld [vmem:[%s2960_s1 + $0x110] sm:$0xff]  }
  0x1b   :  { %v83_v34 = vld [vmem:[%s2961_s0 + $0x1c0] sm:$0xff]  ;;  %v90_v35 = vld [vmem:[%s2961_s0 + $0x1f8] sm:$0xff]  ;;  %v85_v36 = vld [vmem:[%s2961_s0 + $0x1d0] sm:$0xff] }
  0x1c   :  { %1678 = vmatpush3.bf16.msra.mxu0 %v2022_v26  ;;  %v93_v26 = vld [vmem:[%s2961_s0 + $0x210] sm:$0xff]  ;;  %v92_v37 = vld [vmem:[%s2961_s0 + $0x208] sm:$0xff]  ;;  %v98_v38 = vld [vmem:[%s2961_s0 + $0x238] sm:$0xff] }
  0x1d   :  { %1742 = vmatpush3.bf16.msra.mxu1 %v2023_v27  ;;  %1679 = vmatprep.subr.bf16.mxu0 %v2024_v28  ;;  %v2037_v27 = vld [vmem:[%s2960_s1 + $0x118] sm:$0xff]   ;;  %v160_v28 = vpack.c.bf16 %v76_v19, %v69_v18  ;;  %v105_v39 = vld [vmem:[%s2961_s0 + $0x270] sm:$0xff]  ;;  %v107_v41 = vld [vmem:[%s2961_s0 + $0x280] sm:$0xff] }
  0x1e   :  { %1743 = vmatprep.subr.bf16.mxu1 %v2025_v29  ;;  %v162_v29 = vpack.c.bf16 %v78_v21, %v71_v20  ;;  %v2040_v42 = vld [vmem:[%s2960_s1 + $0x148] sm:$0xff]   ;;  %v175_v46 = vpack.c.bf16 %v105_v39, %v98_v38  ;;  %v97_v48 = vld [vmem:[%s2961_s0 + $0x230] sm:$0xff]  ;;  %v2042_v49 = vld [vmem:[%s2960_s1 + $0x140] sm:$0xff]  }
  0x1f   :  { %v2043_v52 = vld [vmem:[%s2960_s1 + $0x100] sm:$0xff]   ;;  %v106_v53 = vld [vmem:[%s2961_s0 + $0x278] sm:$0xff]  ;;  %v112_v54 = vld [vmem:[%s2961_s0 + $0x2a8] sm:$0xff] }
  0x20   :  { %1680 = vmatpush3.bf16.msra.mxu0 %v2026_v30  ;;  %v168_v30 = vpack.c.bf16 %v91_v23, %v84_v22  ;;  %v119_v55 = vld [vmem:[%s2961_s0 + $0x2e0] sm:$0xff]  ;;  %v118_v0 = vld [vmem:[%s2961_s0 + $0x2d8] sm:$0xff]  ;;  %v120_v2 = vld [vmem:[%s2961_s0 + $0x2e8] sm:$0xff] }
  0x21   :  { %1744 = vmatpush3.bf16.msra.mxu1 %v2027_v31  ;;  %1793 = vmatprep.subr.bf16.mxu0 %v2028_v44  ;;  %v170_v31 = vpack.c.bf16 %v93_v26, %v86_v25  ;;  %v182_v61 = vpack.c.bf16 %v119_v55, %v112_v54  ;;  %v111_v63 = vld [vmem:[%s2961_s0 + $0x2a0] sm:$0xff]  ;;  %v126_v3 = vld [vmem:[%s2961_s0 + $0x318] sm:$0xff]  ;;  %v133_v4 = vld [vmem:[%s2961_s0 + $0x350] sm:$0xff] }
  0x22   :  { %1980 = vmatprep.subr.bf16.mxu1 %v2028_v44  ;;  %v2041_v44 = vld [vmem:[%s2960_s1 + $0x108] sm:$0xff]   ;;  %v181_v7 = vpack.c.bf16 %v118_v0, %v111_v63  ;;  %v189_v9 = vpack.c.bf16 %v133_v4, %v126_v3  ;;  %v125_v11 = vld [vmem:[%s2961_s0 + $0x310] sm:$0xff]  ;;  %v123_v18 = vld [vmem:[%s2961_s0 + $0x300] sm:$0xff] }
  0x23   :  { %652 = vmatmul.mubr.bf16.vlgmr.msra.gmra.mxu0 %v139_v40  ;;  %v100_v40 = vld [vmem:[%s2961_s0 + $0x248] sm:$0xff]  ;;  %v31_v23 = vld [vmem:[%s2961_s0 + $0x20] sm:$0xff]  ;;  %v122_v26 = vld [vmem:[%s2961_s0 + $0x2f8] sm:$0xff] }
  0x24   :  { %749 = vmatmul.mubr.bf16.vlgmr.msra.gmra.mxu1 %v141_v43  ;;  %1794 = vmatpush3.bf16.msra.mxu0 %v2029_v45  ;;  %v167_v43 = vpack.c.bf16 %v90_v35, %v83_v34  ;;  %v177_v47 = vpack.c.bf16 %v107_v41, %v100_v40  ;;  %v115_v25 = vld [vmem:[%s2961_s0 + $0x2c0] sm:$0xff]  ;;  %v45_v35 = vld [vmem:[%s2961_s0 + $0x90] sm:$0xff]  ;;  %v136_v38 = vld [vmem:[%s2961_s0 + $0x368] sm:$0xff] }
  0x25   :  { %1988 = vmatpush3.bf16.msra.mxu1 %v2029_v45  ;;  %659 = vmatprep.mubr.bf16.mxu0 %v147_v50  ;;  %v169_v45 = vpack.c.bf16 %v92_v37, %v85_v36  ;;  %v104_v50 = vld [vmem:[%s2961_s0 + $0x268] sm:$0xff]  ;;  %v129_v37 = vld [vmem:[%s2961_s0 + $0x330] sm:$0xff]  ;;  %v67_v40 = vld [vmem:[%s2961_s0 + $0x140] sm:$0xff] }
  0x26   :  { %756 = vmatprep.mubr.bf16.mxu1 %v149_v51  ;;  %1795 = vmatprep.subr.bf16.mxu0 %v2030_v57  ;;  %v99_v51 = vld [vmem:[%s2961_s0 + $0x240] sm:$0xff]  ;;  %v52_v36 = vld [vmem:[%s2961_s0 + $0xc8] sm:$0xff]  ;;  %v33_v41 = vld [vmem:[%s2961_s0 + $0x30] sm:$0xff] }
  0x27   :  { %1981 = vmatprep.subr.bf16.mxu1 %v2030_v57  ;;  %v121_v57 = vld [vmem:[%s2961_s0 + $0x2f0] sm:$0xff]  ;;  %v176_v60 = vpack.c.bf16 %v106_v53, %v99_v51  ;;  %v60_v39 = vld [vmem:[%s2961_s0 + $0x108] sm:$0xff]  ;;  %v74_v51 = vld [vmem:[%s2961_s0 + $0x178] sm:$0xff] }
  0x28   :  { %1796 = vmatpush3.bf16.msra.mxu0 %v2031_v59  ;;  %v61_v53 = vld [vmem:[%s2961_s0 + $0x110] sm:$0xff]  ;;  %v68_v54 = vld [vmem:[%s2961_s0 + $0x148] sm:$0xff]  ;;  %v95_v0 = vld [vmem:[%s2961_s0 + $0x220] sm:$0xff] }
  0x29   :  { %1989 = vmatpush3.bf16.msra.mxu1 %v2031_v59  ;;  %1797 = vmatprep.subr.bf16.mxu0 %v2032_v5  ;;  %v2044_v59 = vld [vmem:[%s2960_s1 + $0x180] sm:$0xff]   ;;  %v88_v63 = vld [vmem:[%s2961_s0 + $0x1e8] sm:$0xff] }
  0x2a   :  { %1982 = vmatprep.subr.bf16.mxu1 %v2032_v5  ;;  %v128_v5 = vld [vmem:[%s2961_s0 + $0x328] sm:$0xff] }
  0x2b   :  { %660 = vmatmul.mubr.bf16.gmra.mxu0 %v146_v56  ;;  %v114_v56 = vld [vmem:[%s2961_s0 + $0x2b8] sm:$0xff] }
  0x2c   :  { %757 = vmatmul.mubr.bf16.gmra.mxu1 %v148_v58  ;;  %667 = vmatprep.mubr.bf16.mxu0 %v154_v62  ;;  %v174_v58 = vpack.c.bf16 %v104_v50, %v97_v48  ;;  %v184_v62 = vpack.c.bf16 %v121_v57, %v114_v56  ;;  %v66_v48 = vld [vmem:[%s2961_s0 + $0x138] sm:$0xff] }
  0x2d   :  { %764 = vmatprep.mubr.bf16.mxu1 %v156_v1  ;;  %1798 = vmatpush3.bf16.msra.mxu0 %v2033_v6  ;;  %v113_v1 = vld [vmem:[%s2961_s0 + $0x2b0] sm:$0xff]  ;;  %v54_v50 = vld [vmem:[%s2961_s0 + $0xd8] sm:$0xff] }
  0x2e   :  { %1990 = vmatpush3.bf16.msra.mxu1 %v2033_v6  ;;  %1799 = vmatprep.subr.bf16.mxu0 %v2034_v15  ;;  %v135_v6 = vld [vmem:[%s2961_s0 + $0x360] sm:$0xff]  ;;  %v183_v8 = vpack.c.bf16 %v120_v2, %v113_v1  ;;  %v89_v1 = vld [vmem:[%s2961_s0 + $0x1f0] sm:$0xff]  ;;  %v96_v2 = vld [vmem:[%s2961_s0 + $0x228] sm:$0xff] }
  0x2f   :  { %1983 = vmatprep.subr.bf16.mxu1 %v2034_v15  ;;  %v191_v10 = vpack.c.bf16 %v135_v6, %v128_v5  ;;  %v32_v15 = vld [vmem:[%s2961_s0 + $0x28] sm:$0xff]  ;;  %v172_v5 = vpack.c.bf16 %v95_v0, %v88_v63  ;;  %v173_v6 = vpack.c.bf16 %v96_v2, %v89_v1  ;;  %v2057_v0 = vld [vmem:[%s2964_s5 + $0x18] sm:$0xff]  }
  0x31   :  { %1800 = vmatpush3.bf16.msra.mxu0 %v2035_v17 }
  0x32   :  { %1991 = vmatpush3.bf16.msra.mxu1 %v2035_v17  ;;  %1801 = vmatprep.subr.bf16.mxu0 %v2036_v24  ;;  %v116_v17 = vld [vmem:[%s2961_s0 + $0x2c8] sm:$0xff] }
  0x33   :  { %668 = vmatmul.mubr.bf16.gmra.mxu0 %v153_v12  ;;  %1984 = vmatprep.subr.bf16.mxu1 %v2036_v24  ;;  %v132_v12 = vld [vmem:[%s2961_s0 + $0x348] sm:$0xff]  ;;  %v186_v22 = vpack.c.bf16 %v123_v18, %v116_v17  ;;  %v38_v24 = vld [vmem:[%s2961_s0 + $0x58] sm:$0xff] }
  0x34   :  { %765 = vmatmul.mubr.bf16.gmra.mxu1 %v155_v13  ;;  %675 = vmatprep.mubr.bf16.mxu0 %v161_v14  ;;  %v127_v13 = vld [vmem:[%s2961_s0 + $0x320] sm:$0xff]  ;;  %v134_v14 = vld [vmem:[%s2961_s0 + $0x358] sm:$0xff]  ;;  %v188_v19 = vpack.c.bf16 %v132_v12, %v125_v11  ;;  %v109_v12 = vld [vmem:[%s2961_s0 + $0x290] sm:$0xff] }
  0x35   :  { %772 = vmatprep.mubr.bf16.mxu1 %v163_v16  ;;  %1802 = vmatpush3.bf16.msra.mxu0 %v2037_v27  ;;  %v39_v16 = vld [vmem:[%s2961_s0 + $0x60] sm:$0xff]  ;;  %v190_v20 = vpack.c.bf16 %v134_v14, %v127_v13  ;;  %v102_v11 = vld [vmem:[%s2961_s0 + $0x258] sm:$0xff]  ;;  %v117_v13 = vld [vmem:[%s2961_s0 + $0x2d0] sm:$0xff] }
  0x36   :  { %1992 = vmatpush3.bf16.msra.mxu1 %v2037_v27  ;;  %1803 = vmatprep.subr.bf16.mxu0 %v2038_v32  ;;  %v144_v21 = vpack.c.bf16 %v39_v16, %v32_v15  ;;  %v46_v27 = vld [vmem:[%s2961_s0 + $0x98] sm:$0xff]  ;;  %v124_v14 = vld [vmem:[%s2961_s0 + $0x308] sm:$0xff]  ;;  %v179_v17 = vpack.c.bf16 %v109_v12, %v102_v11 }
  0x37   :  { %1985 = vmatprep.subr.bf16.mxu1 %v2038_v32  ;;  %v185_v32 = vpack.c.bf16 %v122_v26, %v115_v25  ;;  %v187_v18 = vpack.c.bf16 %v124_v14, %v117_v13  ;;  %v2045_v25 = vld [vmem:[%s2962_s3 + $0x38] sm:$0xff]   ;;  %v2046_v26 = vld [vmem:[%s2962_s3 + $0x30] sm:$0xff]  }
  0x39   :  { %1804 = vmatpush3.bf16.msra.mxu0 %v2039_v33 }
  0x3a   :  { %1993 = vmatpush3.bf16.msra.mxu1 %v2039_v33  ;;  %1805 = vmatprep.subr.bf16.mxu0 %v2040_v42 }
  0x3b   :  { %676 = vmatmul.mubr.bf16.gmra.mxu0 %v160_v28  ;;  %1986 = vmatprep.subr.bf16.mxu1 %v2040_v42  ;;  %v53_v28 = vld [vmem:[%s2961_s0 + $0xd0] sm:$0xff]  ;;  %v40_v42 = vld [vmem:[%s2961_s0 + $0x68] sm:$0xff] }
  0x3c   :  { %773 = vmatmul.mubr.bf16.gmra.mxu1 %v162_v29  ;;  %683 = vmatprep.mubr.bf16.mxu0 %v168_v30  ;;  %v130_v29 = vld [vmem:[%s2961_s0 + $0x338] sm:$0xff]  ;;  %v137_v30 = vld [vmem:[%s2961_s0 + $0x370] sm:$0xff]  ;;  %v151_v33 = vpack.c.bf16 %v53_v28, %v46_v27  ;;  %v2047_v27 = vld [vmem:[%s2962_s3 + $0x28] sm:$0xff]  }
  0x3d   :  { %780 = vmatprep.mubr.bf16.mxu1 %v170_v31  ;;  %1806 = vmatpush3.bf16.msra.mxu0 %v2041_v44  ;;  %v143_v31 = vpack.c.bf16 %v38_v24, %v31_v23  ;;  %v193_v34 = vpack.c.bf16 %v137_v30, %v130_v29  ;;  %v2048_v28 = vld [vmem:[%s2962_s3 + $0x20] sm:$0xff]   ;;  %v2049_v29 = vld [vmem:[%s2962_s3 + $0x18] sm:$0xff]   ;;  %v2050_v30 = vld [vmem:[%s2962_s3 + $0x10] sm:$0xff]  }
  0x3e   :  { %1994 = vmatpush3.bf16.msra.mxu1 %v2041_v44  ;;  %1807 = vmatprep.subr.bf16.mxu0 %v2042_v49  ;;  %v192_v44 = vpack.c.bf16 %v136_v38, %v129_v37  ;;  %v2053_v37 = vld [vmem:[%s2964_s5 + $0x38] sm:$0xff]  }
  0x3f   :  { %1987 = vmatprep.subr.bf16.mxu1 %v2042_v49  ;;  %v47_v49 = vld [vmem:[%s2961_s0 + $0xa0] sm:$0xff] }
  0x40   :  { %v152_v56 = vpack.c.bf16 %v54_v50, %v47_v49 }
  0x41   :  { %1808 = vmatpush3.bf16.msra.mxu0 %v2043_v52 }
  0x42   :  { %1995 = vmatpush3.bf16.msra.mxu1 %v2043_v52  ;;  %v81_v52 = vld [vmem:[%s2961_s0 + $0x1b0] sm:$0xff]  ;;  %1948 = vmatprep.subr.bf16.mxu0 %v2053_v37 }
  0x43   :  { %684 = vmatmul.mubr.bf16.gmra.mxu0 %v167_v43  ;;  %1898 = vmatprep.subr.bf16.mxu1 %v2044_v59  ;;  %v150_v43 = vpack.c.bf16 %v52_v36, %v45_v35  ;;  %v165_v57 = vpack.c.bf16 %v81_v52, %v74_v51  ;;  %v2683_v35 = vld [vmem:[%s2963_s2] ss:$0 sm:$0xff] }
  0x44   :  { %781 = vmatmul.mubr.bf16.gmra.mxu1 %v169_v45  ;;  %691 = vmatprep.mubr.bf16.mxu0 %v175_v46  ;;  %v158_v45 = vpack.c.bf16 %v67_v40, %v60_v39  ;;  %v145_v46 = vpack.c.bf16 %v40_v42, %v33_v41  ;;  %v2054_v40 = vld [vmem:[%s2964_s5 + $0x30] sm:$0xff]  }
  0x45   :  { %788 = vmatprep.mubr.bf16.mxu1 %v177_v47  ;;  %v59_v47 = vld [vmem:[%s2961_s0 + $0x100] sm:$0xff] }
  0x46   :  { %v157_v55 = vpack.c.bf16 %v66_v48, %v59_v47 }
  0x4b   :  { %692 = vmatmul.mubr.bf16.gmra.mxu0 %v174_v58  ;;  %v159_v58 = vpack.c.bf16 %v68_v54, %v61_v53 }
  0x4c   :  { %789 = vmatmul.mubr.bf16.gmra.mxu1 %v176_v60  ;;  %699 = vmatprep.mubr.bf16.mxu0 %v182_v61  ;;  %v80_v60 = vld [vmem:[%s2961_s0 + $0x1a8] sm:$0xff]  ;;  %v75_v61 = vld [vmem:[%s2961_s0 + $0x180] sm:$0xff] }
  0x4d   :  { %796 = vmatprep.mubr.bf16.mxu1 %v184_v62  ;;  %v82_v62 = vld [vmem:[%s2961_s0 + $0x1b8] sm:$0xff] }
  0x4e   :  { %v166_v4 = vpack.c.bf16 %v82_v62, %v75_v61 }
  0x53   :  { %700 = vmatmul.mubr.bf16.gmra.mxu0 %v181_v7  ;;  %v87_v7 = vld [vmem:[%s2961_s0 + $0x1e0] sm:$0xff] }
  0x54   :  { %797 = vmatmul.mubr.bf16.gmra.mxu1 %v183_v8  ;;  %707 = vmatprep.mubr.bf16.mxu0 %v189_v9  ;;  %v94_v8 = vld [vmem:[%s2961_s0 + $0x218] sm:$0xff]  ;;  %v103_v9 = vld [vmem:[%s2961_s0 + $0x260] sm:$0xff] }
  0x55   :  { %804 = vmatprep.mubr.bf16.mxu1 %v191_v10  ;;  %v110_v10 = vld [vmem:[%s2961_s0 + $0x298] sm:$0xff]  ;;  %v171_v15 = vpack.c.bf16 %v94_v8, %v87_v7 }
  0x56   :  { %v180_v16 = vpack.c.bf16 %v110_v10, %v103_v9  ;;  %v2058_v9 = vld [vmem:[%s2964_s5 + $0x10] sm:$0xff]  }
  0x5b   :  { %708 = vmatmul.mubr.bf16.gmra.mxu0 %v188_v19  ;;  %v101_v19 = vld [vmem:[%s2961_s0 + $0x250] sm:$0xff] }
  0x5c   :  { %805 = vmatmul.mubr.bf16.gmra.mxu1 %v190_v20  ;;  %845 = vmatprep.mubr.bf16.mxu0 %v144_v21  ;;  %v108_v20 = vld [vmem:[%s2961_s0 + $0x288] sm:$0xff]  ;;  %v131_v21 = vld [vmem:[%s2961_s0 + $0x340] sm:$0xff] }
  0x5d   :  { %893 = vmatprep.mubr.bf16.mxu1 %v186_v22  ;;  %v138_v22 = vld [vmem:[%s2961_s0 + $0x378] sm:$0xff]  ;;  %v178_v23 = vpack.c.bf16 %v108_v20, %v101_v19 }
  0x5e   :  { %v194_v24 = vpack.c.bf16 %v138_v22, %v131_v21 }
  0x63   :  { %846 = vmatmul.mubr.bf16.vlgmr.msra.gmra.mxu0 %v143_v31  ;;  %v2051_v31 = vld [vmem:[%s2962_s3 + $0x8] sm:$0xff]  }
  0x64   :  { %894 = vmatmul.mubr.bf16.vlgmr.msra.gmra.mxu1 %v185_v32  ;;  %853 = vmatprep.mubr.bf16.mxu0 %v151_v33  ;;  %v2052_v32 = vld [vmem:[%s2962_s3] sm:$0xff]  }
  0x65   :  { %1899 = vmatpush3.bf16.msra.mxu1 %v2044_v59  ;;  %901 = vmatprep.mubr.bf16.mxu1 %v193_v34  ;;  %v73_v59 = vld [vmem:[%s2961_s0 + $0x170] sm:$0xff] }
  0x66   :  { %v164_v3 = vpack.c.bf16 %v80_v60, %v73_v59  ;;  %1916 = vmatprep.subr.bf16.mxu1 %v2045_v25  ;;  %1949 = vmatpush3.bf16.msra.mxu0 %v2053_v37 }
  0x67   :  { %1950 = vmatprep.subr.bf16.mxu0 %v2054_v40 }
  0x6a   :  { %1951 = vmatpush3.bf16.msra.mxu0 %v2054_v40 }
  0x6b   :  { %854 = vmatmul.mubr.bf16.gmra.mxu0 %v150_v43 }
  0x6c   :  { %902 = vmatmul.mubr.bf16.gmra.mxu1 %v192_v44  ;;  %861 = vmatprep.mubr.bf16.mxu0 %v158_v45 }
  0x6d   :  { %1900 = vmatprep.mubr.msk.bf16.mxu1 %vm594_vm0, %v145_v46  ;;  %v2055_v46 = vld [vmem:[%s2964_s5 + $0x28] sm:$0xff]  }
  0x6e   :  { %1952 = vmatprep.subr.bf16.mxu0 %v2055_v46 }
  0x6f   :  { %1953 = vmatpush3.bf16.msra.mxu0 %v2055_v46 }
  0x73   :  { %862 = vmatmul.mubr.bf16.gmra.mxu0 %v157_v55  ;;  %v2056_v55 = vld [vmem:[%s2964_s5 + $0x20] sm:$0xff]  }
  0x74   :  { %1901 = vmatmul.mubr.msk.bf16.vlgmr.msra.gmra.mxu1 %vm594_vm0, %v152_v56  ;;  %869 = vmatprep.mubr.bf16.mxu0 %v165_v57 }
  0x75   :  { %1904 = vmatprep.mubr.msk.bf16.mxu1 %vm594_vm0, %v159_v58  ;;  %1917 = vmatpush3.bf16.msra.mxu1 %v2045_v25 }
  0x76   :  { %1918 = vmatprep.subr.bf16.mxu1 %v2046_v26  ;;  %1954 = vmatprep.subr.bf16.mxu0 %v2056_v55 }
  0x77   :  { %1955 = vmatpush3.bf16.msra.mxu0 %v2056_v55 }
  0x78   :  { %1956 = vmatprep.subr.bf16.mxu0 %v2057_v0 }
  0x79   :  { %1919 = vmatpush3.bf16.msra.mxu1 %v2046_v26 }
  0x7a   :  { %1920 = vmatprep.subr.bf16.mxu1 %v2047_v27 }
  0x7b   :  { %870 = vmatmul.mubr.bf16.gmra.mxu0 %v164_v3 }
  0x7c   :  { %1905 = vmatmul.mubr.msk.bf16.gmra.mxu1 %vm594_vm0, %v166_v4  ;;  %877 = vmatprep.mubr.bf16.mxu0 %v172_v5 }
  0x7d   :  { %1908 = vmatprep.mubr.msk.bf16.mxu1 %vm594_vm0, %v173_v6  ;;  %1921 = vmatpush3.bf16.msra.mxu1 %v2047_v27 }
  0x7e   :  { %1922 = vmatprep.subr.bf16.mxu1 %v2048_v28  ;;  %1957 = vmatpush3.bf16.msra.mxu0 %v2057_v0 }
  0x7f   :  { %1958 = vmatprep.subr.bf16.mxu0 %v2058_v9 }
  0x81   :  { %1923 = vmatpush3.bf16.msra.mxu1 %v2048_v28 }
  0x82   :  { %1924 = vmatprep.subr.bf16.mxu1 %v2049_v29  ;;  %1959 = vmatpush3.bf16.msra.mxu0 %v2058_v9 }
  0x83   :  { %878 = vmatmul.mubr.bf16.gmra.mxu0 %v171_v15 }
  0x84   :  { %1909 = vmatmul.mubr.msk.bf16.gmra.mxu1 %vm594_vm0, %v180_v16  ;;  %885 = vmatprep.mubr.bf16.mxu0 %v179_v17 }
  0x85   :  { %1912 = vmatprep.mubr.msk.bf16.mxu1 %vm594_vm0, %v187_v18  ;;  %1925 = vmatpush3.bf16.msra.mxu1 %v2049_v29 }
  0x86   :  { %1926 = vmatprep.subr.bf16.mxu1 %v2050_v30 }
  0x89   :  { %1927 = vmatpush3.bf16.msra.mxu1 %v2050_v30 }
  0x8a   :  { %1928 = vmatprep.subr.bf16.mxu1 %v2051_v31 }
  0x8b   :  { %886 = vmatmul.mubr.bf16.gmra.mxu0 %v178_v23 }
  0x8c   :  { %1913 = vmatmul.mubr.msk.bf16.gmra.mxu1 %vm594_vm0, %v194_v24 }
  0x8d   :  { %1929 = vmatpush3.bf16.msra.mxu1 %v2051_v31 }
  0x8e   :  { %1930 = vmatprep.subr.bf16.mxu1 %v2052_v32 }
  0x91   :  { %1931 = vmatpush3.bf16.msra.mxu1 %v2052_v32 }
  0xe3   :  { %v1681_v33 = vpop.f32.mrf.mxu0 }
  0xe4   :  { %v1745_v34 = vpop.f32.mrf.mxu1 }
  0xe5   :  { %v1682_v36 = vpop.f32.mrf.mxu0 }
  0xe6   :  { %v1683_v38 = vadd.f32 %v1682_v36, %v1681_v33  ;;  %v1746_v39 = vpop.f32.mrf.mxu1 }
  0xe7   :  { %v1747_v41 = vadd.f32 %v1746_v39, %v1745_v34  ;;  %v1684_v42 = vpop.f32.mrf.mxu0 }
  0xe8   :  { %v654_v43 = vadd.f32 %v1683_v38, %v2683_v35  ;;  %v1748_v44 = vpop.f32.mrf.mxu1 }
  0xe9   :  { %v1685_v45 = vpop.f32.mrf.mxu0 }
  0xea   :  { %v2695_v47 = vadd.f32 %v1747_v41, %v654_v43  ;;  %v1686_v48 = vadd.f32 %v1685_v45, %v1684_v42  ;;  %v1749_v49 = vpop.f32.mrf.mxu1 }
  0xeb   :  { %v1750_v50 = vadd.f32 %v1749_v49, %v1748_v44  ;;  %v1687_v51 = vpop.f32.mrf.mxu0 }
  0xec   :  { %v657_v52 = vadd.f32 %v1686_v48, %v2683_v35  ;;  %v1751_v53 = vpop.f32.mrf.mxu1 }
  0xed   :  { %v1688_v54 = vpop.f32.mrf.mxu0 }
  0xee   :  { %v2701_v56 = vadd.f32 %v1750_v50, %v657_v52  ;;  %v1689_v57 = vadd.f32 %v1688_v54, %v1687_v51  ;;  %v1752_v58 = vpop.f32.mrf.mxu1 }
  0xef   :  { %v1753_v59 = vadd.f32 %v1752_v58, %v1751_v53  ;;  %v1690_v60 = vpop.f32.mrf.mxu0 }
  0xf0   :  { %v662_v61 = vadd.f32 %v1689_v57, %v2683_v35  ;;  %v1754_v62 = vpop.f32.mrf.mxu1 }
  0xf1   :  { %v1691_v63 = vpop.f32.mrf.mxu0 }
  0xf2   :  { %v2707_v1 = vadd.f32 %v1753_v59, %v662_v61  ;;  %v1692_v2 = vadd.f32 %v1691_v63, %v1690_v60  ;;  %v1755_v3 = vpop.f32.mrf.mxu1 }
  0xf3   :  { %v1756_v4 = vadd.f32 %v1755_v3, %v1754_v62  ;;  %v1693_v5 = vpop.f32.mrf.mxu0 }
  0xf4   :  { %v665_v6 = vadd.f32 %v1692_v2, %v2683_v35  ;;  %v1757_v7 = vpop.f32.mrf.mxu1 }
  0xf5   :  { %v1694_v8 = vpop.f32.mrf.mxu0 }
  0xf6   :  { %v2713_v10 = vadd.f32 %v1756_v4, %v665_v6  ;;  %v1695_v11 = vadd.f32 %v1694_v8, %v1693_v5  ;;  %v1758_v12 = vpop.f32.mrf.mxu1 }
  0xf7   :  { %v1759_v13 = vadd.f32 %v1758_v12, %v1757_v7  ;;  %v1696_v14 = vpop.f32.mrf.mxu0 }
  0xf8   :  { %v670_v15 = vadd.f32 %v1695_v11, %v2683_v35  ;;  %v1760_v16 = vpop.f32.mrf.mxu1 }
  0xf9   :  { %v1697_v17 = vpop.f32.mrf.mxu0 }
  0xfa   :  { %v2716_v18 = vadd.f32 %v1759_v13, %v670_v15  ;;  %v1698_v19 = vadd.f32 %v1697_v17, %v1696_v14  ;;  %v1761_v20 = vpop.f32.mrf.mxu1 }
  0xfb   :  { %v1762_v21 = vadd.f32 %v1761_v20, %v1760_v16  ;;  %v1699_v22 = vpop.f32.mrf.mxu0 }
  0xfc   :  { %v673_v23 = vadd.f32 %v1698_v19, %v2683_v35  ;;  %v1763_v24 = vpop.f32.mrf.mxu1 }
  0xfd   :  { %v1700_v25 = vpop.f32.mrf.mxu0 }
  0xfe   :  { %v2719_v26 = vadd.f32 %v1762_v21, %v673_v23  ;;  %v1701_v27 = vadd.f32 %v1700_v25, %v1699_v22  ;;  %v1764_v28 = vpop.f32.mrf.mxu1 }
  0xff   :  { %v1765_v29 = vadd.f32 %v1764_v28, %v1763_v24  ;;  %v2721_v30 = vpop.f32.mrf.mxu0 }
 0x100   :  { %v678_v31 = vadd.f32 %v1701_v27, %v2683_v35  ;;  %v2724_v32 = vpop.f32.mrf.mxu1 }
 0x101   :  { %v2726_v33 = vpop.f32.mrf.mxu0 }
 0x102   :  { %v2728_v34 = vadd.f32 %v1765_v29, %v678_v31  ;;  %v2730_v36 = vpop.f32.mrf.mxu1 }
 0x103   :  { %v1705_v37 = vpop.f32.mrf.mxu0 }
 0x104   :  { %v1769_v38 = vpop.f32.mrf.mxu1 }
 0x105   :  { %v1706_v39 = vpop.f32.mrf.mxu0 }
 0x106   :  { %v1707_v40 = vadd.f32 %v1706_v39, %v1705_v37  ;;  %v1770_v41 = vpop.f32.mrf.mxu1 }
 0x107   :  { %v1771_v42 = vadd.f32 %v1770_v41, %v1769_v38  ;;  %v2732_v43 = vpop.f32.mrf.mxu0 }
 0x108   :  { %v686_v44 = vadd.f32 %v1707_v40, %v2683_v35  ;;  %v2735_v45 = vpop.f32.mrf.mxu1 }
 0x109   :  { %v2737_v46 = vpop.f32.mrf.mxu0 }
 0x10a   :  { %v2739_v48 = vadd.f32 %v1771_v42, %v686_v44  ;;  %v2741_v49 = vpop.f32.mrf.mxu1 }
 0x10b   :  { %v1711_v50 = vpop.f32.mrf.mxu0 }
 0x10c   :  { %v1775_v51 = vpop.f32.mrf.mxu1 }
 0x10d   :  { %v1712_v52 = vpop.f32.mrf.mxu0 }
 0x10e   :  { %v1713_v53 = vadd.f32 %v1712_v52, %v1711_v50  ;;  %v1776_v54 = vpop.f32.mrf.mxu1 }
 0x10f   :  { %v1777_v55 = vadd.f32 %v1776_v54, %v1775_v51  ;;  %v2743_v57 = vpop.f32.mrf.mxu0 }
 0x110   :  { %v694_v58 = vadd.f32 %v1713_v53, %v2683_v35  ;;  %v2746_v59 = vpop.f32.mrf.mxu1 }
 0x111   :  { %v2748_v60 = vpop.f32.mrf.mxu0 }
 0x112   :  { %v2750_v61 = vadd.f32 %v1777_v55, %v694_v58  ;;  %v2752_v62 = vpop.f32.mrf.mxu1 }
 0x113   :  { %v2754_v63 = vpop.f32.mrf.mxu0 }
 0x114   :  { %v2756_v0 = vpop.f32.mrf.mxu1 }
 0x115   :  { %v2758_v2 = vpop.f32.mrf.mxu0 }
 0x116   :  { %v2760_v3 = vpop.f32.mrf.mxu1 }
 0x117   :  { %v2762_v4 = vpop.f32.mrf.mxu0 }
 0x118   :  { %v2764_v5 = vpop.f32.mrf.mxu1 }
 0x119   :  { %v2766_v6 = vpop.f32.mrf.mxu0 }
 0x11a   :  { %v2768_v7 = vpop.f32.mrf.mxu1 }
 0x11b   :  { %v2770_v8 = vpop.f32.mrf.mxu0 }
 0x11c   :  { %v2772_v9 = vpop.f32.mrf.mxu1 }
 0x11d   :  { %2968 = vst [vmem:[#allocation2_spill] sm:$0xff] %v2772_v9  ;;  %v2774_v11 = vpop.f32.mrf.mxu0 }
 0x11e   :  { %v2776_v12 = vpop.f32.mrf.mxu1 }
 0x11f   :  { %2969 = vst [vmem:[#allocation3_spill] sm:$0xff] %v2776_v12  ;;  %v2778_v13 = vpop.f32.mrf.mxu0 }
 0x120   :  { %v2780_v14 = vpop.f32.mrf.mxu1 }
 0x121   :  { %v2782_v15 = vpop.f32.mrf.mxu0 }
 0x122   :  { %v2784_v16 = vpop.f32.mrf.mxu1 }
 0x123   :  { %v1809_v17 = vpop.f32.mrf.mxu0 }
 0x124   :  { %v2786_v19 = vpop.f32.mrf.mxu1 }
 0x125   :  { %v1810_v20 = vpop.f32.mrf.mxu0 }
 0x126   :  { %v2788_v21 = vpop.f32.mrf.mxu1  ;;  %v1811_v42 = vadd.f32 %v1810_v20, %v1809_v17  ;;  %v1704_v20 = vadd.f32 %v2726_v33, %v2721_v30  ;;  %v1768_v33 = vadd.f32 %v2730_v36, %v2724_v32 }
 0x127   :  { %v1812_v22 = vpop.f32.mrf.mxu0 }
 0x128   :  { %v2790_v23 = vpop.f32.mrf.mxu1 }
 0x129   :  { %v1813_v24 = vpop.f32.mrf.mxu0 }
 0x12a   :  { %v2792_v25 = vpop.f32.mrf.mxu1  ;;  %v1814_v52 = vadd.f32 %v1813_v24, %v1812_v22 }
 0x12b   :  { %v1815_v27 = vpop.f32.mrf.mxu0 }
 0x12c   :  { %v2794_v28 = vpop.f32.mrf.mxu1  ;;  %v851_v17 = vadd.f32 %v1814_v52, %v2701_v56 }
 0x12d   :  { %2970 = vst [vmem:[#allocation4_spill] sm:$0xff] %v2794_v28  ;;  %v1816_v29 = vpop.f32.mrf.mxu0  ;;  %v848_v28 = vadd.f32 %v1811_v42, %v2695_v47 }
 0x12e   :  { %v2796_v31 = vpop.f32.mrf.mxu1  ;;  %v1817_v39 = vadd.f32 %v1816_v29, %v1815_v27 }
 0x12f   :  { %2971 = vst [vmem:[#allocation5_spill] sm:$0xff] %v2796_v31  ;;  %v1818_v37 = vpop.f32.mrf.mxu0 }
 0x130   :  { %v2798_v38 = vpop.f32.mrf.mxu1  ;;  %v856_v53 = vadd.f32 %v1817_v39, %v2707_v1 }
 0x131   :  { %2972 = vst [vmem:[#allocation6_spill] sm:$0xff] %v2798_v38  ;;  %v1819_v40 = vpop.f32.mrf.mxu0 }
 0x132   :  { %v2800_v41 = vpop.f32.mrf.mxu1  ;;  %v1820_v44 = vadd.f32 %v1819_v40, %v1818_v37 }
 0x133   :  { %v1821_v50 = vpop.f32.mrf.mxu0 }
 0x134   :  { %v1902_v51 = vpop.f32.mrf.mxu1  ;;  %v859_v12 = vadd.f32 %v1820_v44, %v2713_v10 }
 0x135   :  { %v1822_v54 = vpop.f32.mrf.mxu0  ;;  %v953_v58 = vadd.f32 %v1902_v51, %v856_v53 }
 0x136   :  { %v944_v55 = vpop.f32.mrf.mxu1  ;;  %v1823_v1 = vadd.f32 %v1822_v54, %v1821_v50 }
 0x137   :  { %v1824_v31 = vpop.f32.mrf.mxu0  ;;  %v945_v27 = vadd.f32 %v944_v55, %v848_v28  ;;  %v1009_v24 = vmax.f32 %v953_v58, 0.0 }
 0x138   :  { %v1903_v9 = vpop.f32.mrf.mxu1  ;;  %v864_v52 = vadd.f32 %v1823_v1, %v2716_v18 }
 0x139   :  { %v956_v29 = vadd.f32 %v1903_v9, %v859_v12  ;;  %v1825_v38 = vpop.f32.mrf.mxu0  ;;  %v1007_v47 = vmax.f32 %v945_v27, 0.0  ;;  %v681_v9 = vadd.f32 %v1704_v20, %v2683_v35  ;;  %v1710_v27 = vadd.f32 %v2737_v46, %v2732_v43 }
 0x13a   :  { %v947_v22 = vpop.f32.mrf.mxu1  ;;  %v1826_v53 = vadd.f32 %v1825_v38, %v1824_v31 }
 0x13b   :  { %v1010_v37 = vmax.f32 %v956_v29, 0.0  ;;  %v948_v39 = vadd.f32 %v947_v22, %v851_v17  ;;  %v1827_v40 = vpop.f32.mrf.mxu0  ;;  %v778_v38 = vadd.f32 %v1768_v33, %v681_v9  ;;  %v1719_v9 = vadd.f32 %v2758_v2, %v2754_v63 }
 0x13c   :  { %v1906_v51 = vpop.f32.mrf.mxu1  ;;  %v867_v31 = vadd.f32 %v1826_v53, %v2719_v26  ;;  %v1786_v63 = vadd.f32 %v2768_v7, %v2764_v5  ;;  %v1850_v2 = vadd.f32 %v2792_v25, %v2790_v23  ;;  %v1847_v5 = vadd.f32 %v2788_v21, %v2786_v19 }
 0x13d   :  { %v1024_v42 = vpack.c.bf16 %v1010_v37, %v1009_v24  ;;  %v1008_v10 = vmax.f32 %v948_v39, 0.0  ;;  %v1828_v44 = vpop.f32.mrf.mxu0  ;;  %v689_v37 = vadd.f32 %v1710_v27, %v2683_v35  ;;  %v1780_v23 = vadd.f32 %v2752_v62, %v2746_v59  ;;  %v2973_v62 = vld [vmem:[#allocation6_spill] sm:$0xff] }
 0x13e   :  { %v1829_v12 = vadd.f32 %v1828_v44, %v1827_v40  ;;  %v960_v28 = vpop.f32.mrf.mxu1  ;;  %v1792_v59 = vadd.f32 %v2784_v16, %v2780_v14 }
 0x13f   :  { %v1023_v56 = vpack.c.bf16 %v1008_v10, %v1007_v47  ;;  %v1830_v30 = vpop.f32.mrf.mxu0  ;;  %v961_v55 = vadd.f32 %v960_v28, %v864_v52  ;;  %v1722_v47 = vadd.f32 %v2766_v6, %v2762_v4 }
 0x140   :  { %v872_v50 = vadd.f32 %v1829_v12, %v2728_v34  ;;  %v1907_v54 = vpop.f32.mrf.mxu1 }
 0x141   :  { %1932 = vmatprep.mubr.bf16.mxu1 %v1023_v56  ;;  %v1831_v58 = vpop.f32.mrf.mxu0  ;;  %v1011_v36 = vmax.f32 %v961_v55, 0.0  ;;  %v1716_v56 = vadd.f32 %v2748_v60, %v2743_v57  ;;  %v1728_v60 = vadd.f32 %v2782_v15, %v2778_v13 }
 0x142   :  { %v1832_v29 = vadd.f32 %v1831_v58, %v1830_v30  ;;  %v963_v17 = vpop.f32.mrf.mxu1  ;;  %1933 = vmatmul.mubr.bf16.vlgmr.msra.gmra.mxu1 %v1024_v42  ;;  %v969_v22 = vadd.f32 %v1906_v51, %v872_v50  ;;  %v1774_v42 = vadd.f32 %v2741_v49, %v2735_v45  ;;  %v705_v30 = vadd.f32 %v1722_v47, %v2683_v35 }
 0x143   :  { %v964_v18 = vadd.f32 %v963_v17, %v867_v31  ;;  %v1833_v20 = vpop.f32.mrf.mxu0  ;;  %v697_v57 = vadd.f32 %v1716_v56, %v2683_v35 }
 0x144   :  { %v875_v24 = vadd.f32 %v1832_v29, %v778_v38  ;;  %v1910_v32 = vpop.f32.mrf.mxu1  ;;  %v1013_v53 = vmax.f32 %v969_v22, 0.0  ;;  %v786_v28 = vadd.f32 %v1774_v42, %v689_v37  ;;  %v1783_v38 = vadd.f32 %v2760_v3, %v2756_v0 }
 0x145   :  { %v1012_v34 = vmax.f32 %v964_v18, 0.0  ;;  %v1834_v1 = vpop.f32.mrf.mxu0  ;;  %v802_v27 = vadd.f32 %v1786_v63, %v705_v30  ;;  %v1725_v29 = vadd.f32 %v2774_v11, %v2770_v8  ;;  %v794_v0 = vadd.f32 %v1780_v23, %v697_v57  ;;  %v2060_v30 = vld [vmem:[%s2964_s5] sm:$0xff]  }
 0x146   :  { %v972_v39 = vadd.f32 %v1907_v54, %v875_v24  ;;  %v1835_v40 = vadd.f32 %v1834_v1, %v1833_v20  ;;  %v976_v26 = vpop.f32.mrf.mxu1  ;;  %v713_v3 = vadd.f32 %v1728_v60, %v2683_v35 }
 0x147   :  { %v1025_v43 = vpack.c.bf16 %v1012_v34, %v1011_v36  ;;  %v1836_v46 = vpop.f32.mrf.mxu0  ;;  %v899_v22 = vadd.f32 %v1850_v2, %v802_v27  ;;  %v710_v19 = vadd.f32 %v1725_v29, %v2683_v35 }
 0x148   :  { %v1014_v51 = vmax.f32 %v972_v39, 0.0  ;;  %v880_v10 = vadd.f32 %v1835_v40, %v2739_v48  ;;  %v1911_v44 = vpop.f32.mrf.mxu1  ;;  %v702_v48 = vadd.f32 %v1719_v9, %v2683_v35  ;;  %v2974_v39 = vld [vmem:[#allocation2_spill] sm:$0xff]  ;;  %v2975_v40 = vld [vmem:[#allocation3_spill] sm:$0xff]  ;;  %v810_v47 = vadd.f32 %v1792_v59, %v713_v3 }
 0x149   :  { %1936 = vmatprep.mubr.bf16.mxu1 %v1025_v43  ;;  %v1837_v12 = vpop.f32.mrf.mxu0  ;;  %v2976_v43 = vld [vmem:[#allocation4_spill] sm:$0xff] }
 0x14a   :  { %v1838_v4 = vadd.f32 %v1837_v12, %v1836_v46  ;;  %v979_v6 = vpop.f32.mrf.mxu1  ;;  %v1026_v52 = vpack.c.bf16 %v1014_v51, %v1013_v53  ;;  %v977_v49 = vadd.f32 %v976_v26, %v880_v10  ;;  %v799_v18 = vadd.f32 %v1783_v38, %v702_v48  ;;  %v2977_v46 = vld [vmem:[#allocation5_spill] sm:$0xff] }
 0x14b   :  { %v1839_v45 = vpop.f32.mrf.mxu0  ;;  %v1789_v26 = vadd.f32 %v2975_v40, %v2974_v39  ;;  %v1853_v42 = vadd.f32 %v2977_v46, %v2976_v43 }
 0x14c   :  { %v883_v33 = vadd.f32 %v1838_v4, %v786_v28  ;;  %v1914_v50 = vpop.f32.mrf.mxu1  ;;  %1937 = vmatmul.mubr.bf16.gmra.mxu1 %v1026_v52  ;;  %v1015_v25 = vmax.f32 %v977_v49, 0.0  ;;  %v896_v21 = vadd.f32 %v1847_v5, %v799_v18 }
 0x14d   :  { %v1840_v54 = vpop.f32.mrf.mxu0  ;;  %v807_v51 = vadd.f32 %v1789_v26, %v710_v19 }
 0x14e   :  { %v980_v55 = vadd.f32 %v979_v6, %v883_v33  ;;  %v1841_v58 = vadd.f32 %v1840_v54, %v1839_v45  ;;  %v992_v31 = vpop.f32.mrf.mxu1  ;;  %v1647_v33 = vld [vmem:[%s2965_s4] ss:$0 sm:$0xff] }
 0x14f   :  { %v1842_v7 = vpop.f32.mrf.mxu0  ;;  %v993_v37 = vadd.f32 %v992_v31, %v896_v21  ;;  %v904_v12 = vadd.f32 %v1853_v42, %v807_v51 }
 0x150   :  { %v1016_v17 = vmax.f32 %v980_v55, 0.0  ;;  %v888_v13 = vadd.f32 %v1841_v58, %v2750_v61  ;;  %v1915_v15 = vpop.f32.mrf.mxu1  ;;  %v1856_v61 = vadd.f32 %v2800_v41, %v2973_v62 }
 0x151   :  { %v1843_v20 = vpop.f32.mrf.mxu0  ;;  %v1019_v16 = vmax.f32 %v993_v37, 0.0  ;;  %v1001_v56 = vadd.f32 %v1914_v50, %v904_v12 }
 0x152   :  { %v1027_v24 = vpack.c.bf16 %v1016_v17, %v1015_v25  ;;  %v1844_v8 = vadd.f32 %v1843_v20, %v1842_v7  ;;  %v995_v11 = vpop.f32.mrf.mxu1  ;;  %v985_v34 = vadd.f32 %v1910_v32, %v888_v13  ;;  %v907_v9 = vadd.f32 %v1856_v61, %v810_v47 }
 0x153   :  { %v996_v36 = vadd.f32 %v995_v11, %v899_v22  ;;  %v1021_v6 = vmax.f32 %v1001_v56, 0.0 }
 0x154   :  { %v891_v1 = vadd.f32 %v1844_v8, %v794_v0  ;;  %1940 = vmatprep.mubr.bf16.mxu1 %v1027_v24  ;;  %v1017_v10 = vmax.f32 %v985_v34, 0.0  ;;  %v1004_v41 = vadd.f32 %v1915_v15, %v907_v9 }
 0x155   :  { %v1020_v53 = vmax.f32 %v996_v36, 0.0 }
 0x156   :  { %v988_v35 = vadd.f32 %v1911_v44, %v891_v1  ;;  %v1022_v4 = vmax.f32 %v1004_v41, 0.0  ;;  %v2059_v44 = vld [vmem:[%s2964_s5 + $0x8] sm:$0xff]  }
 0x157   :  { %v1029_v28 = vpack.c.bf16 %v1020_v53, %v1019_v16  ;;  %1960 = vmatprep.subr.bf16.mxu0 %v2059_v44 }
 0x158   :  { %v1018_v14 = vmax.f32 %v988_v35, 0.0  ;;  %v1030_v52 = vpack.c.bf16 %v1022_v4, %v1021_v6  ;;  %1961 = vmatpush3.bf16.msra.mxu0 %v2059_v44 }
 0x159   :  { %1962 = vmatprep.subr.bf16.mxu0 %v2060_v30 }
 0x15a   :  { %v1028_v32 = vpack.c.bf16 %v1018_v14, %v1017_v10 }
 0x15c   :  { %1941 = vmatmul.mubr.bf16.gmra.mxu1 %v1028_v32  ;;  %1963 = vmatpush3.bf16.msra.mxu0 %v2060_v30 }
 0x15d   :  { %1944 = vmatprep.mubr.bf16.mxu1 %v1029_v28  ;;  %v1656_v28 = vld [vmem:[%s2966_s6] ss:$0 sm:$0xff] }
 0x164   :  { %1945 = vmatmul.mubr.bf16.gmra.mxu1 %v1030_v52 }
 0x202   :  { %v1934_v45 = vpop.f32.mrf.mxu1 }
 0x203   :  { %v1145_v2 = vadd.f32 %v1934_v45, %v1647_v33 }
 0x204   :  { %v1136_v49 = vpop.f32.mrf.mxu1 }
 0x205   :  { %v1137_v48 = vadd.f32 %v1647_v33, %v1136_v49  ;;  %v1201_v31 = vmax.f32 %v1145_v2, 0.0 }
 0x206   :  { %v1935_v50 = vpop.f32.mrf.mxu1 }
 0x207   :  { %v1148_v63 = vadd.f32 %v1935_v50, %v1647_v33  ;;  %v1199_v55 = vmax.f32 %v1137_v48, 0.0 }
 0x208   :  { %v1139_v54 = vpop.f32.mrf.mxu1 }
 0x209   :  { %v1140_v57 = vadd.f32 %v1647_v33, %v1139_v54  ;;  %v1202_v60 = vmax.f32 %v1148_v63, 0.0 }
 0x20b   :  { %v1200_v58 = vmax.f32 %v1140_v57, 0.0  ;;  %v1216_v29 = vpack.c.bf16 %v1202_v60, %v1201_v31 }
 0x20c   :  { %v1938_v38 = vpop.f32.mrf.mxu1 }
 0x20d   :  { %v1215_v27 = vpack.c.bf16 %v1200_v58, %v1199_v55  ;;  %v1161_v17 = vadd.f32 %v1938_v38, %v1647_v33 }
 0x20e   :  { %v1152_v5 = vpop.f32.mrf.mxu1 }
 0x20f   :  { %1964 = vmatprep.mubr.bf16.mxu0 %v1215_v27  ;;  %v1153_v23 = vadd.f32 %v1647_v33, %v1152_v5  ;;  %v1205_v0 = vmax.f32 %v1161_v17, 0.0 }
 0x210   :  { %1965 = vmatmul.mubr.bf16.vlgmr.msra.gmra.mxu0 %v1216_v29  ;;  %v1939_v7 = vpop.f32.mrf.mxu1 }
 0x211   :  { %v1164_v25 = vadd.f32 %v1939_v7, %v1647_v33  ;;  %v1203_v20 = vmax.f32 %v1153_v23, 0.0 }
 0x212   :  { %v1155_v13 = vpop.f32.mrf.mxu1 }
 0x213   :  { %v1156_v15 = vadd.f32 %v1647_v33, %v1155_v13  ;;  %v1206_v18 = vmax.f32 %v1164_v25, 0.0 }
 0x215   :  { %v1204_v22 = vmax.f32 %v1156_v15, 0.0  ;;  %v1218_v24 = vpack.c.bf16 %v1206_v18, %v1205_v0 }
 0x217   :  { %v1217_v3 = vpack.c.bf16 %v1204_v22, %v1203_v20 }
 0x219   :  { %1968 = vmatprep.mubr.bf16.mxu0 %v1217_v3 }
 0x21a   :  { %1969 = vmatmul.mubr.bf16.gmra.mxu0 %v1218_v24 }
 0x21c   :  { %v1942_v8 = vpop.f32.mrf.mxu1 }
 0x21d   :  { %v1177_v59 = vadd.f32 %v1942_v8, %v1647_v33 }
 0x21e   :  { %v1168_v11 = vpop.f32.mrf.mxu1 }
 0x21f   :  { %v1169_v21 = vadd.f32 %v1647_v33, %v1168_v11  ;;  %v1209_v40 = vmax.f32 %v1177_v59, 0.0 }
 0x220   :  { %v1943_v19 = vpop.f32.mrf.mxu1 }
 0x221   :  { %v1180_v36 = vadd.f32 %v1943_v19, %v1647_v33  ;;  %v1207_v37 = vmax.f32 %v1169_v21, 0.0 }
 0x222   :  { %v1171_v62 = vpop.f32.mrf.mxu1 }
 0x223   :  { %v1172_v61 = vadd.f32 %v1647_v33, %v1171_v62  ;;  %v1210_v34 = vmax.f32 %v1180_v36, 0.0 }
 0x224   :  { %v1946_v1 = vpop.f32.mrf.mxu1 }
 0x225   :  { %v1208_v39 = vmax.f32 %v1172_v61, 0.0  ;;  %v1220_v43 = vpack.c.bf16 %v1210_v34, %v1209_v40  ;;  %v1193_v53 = vadd.f32 %v1946_v1, %v1647_v33 }
 0x226   :  { %v1184_v26 = vpop.f32.mrf.mxu1 }
 0x227   :  { %v1219_v47 = vpack.c.bf16 %v1208_v39, %v1207_v37  ;;  %v1185_v42 = vadd.f32 %v1647_v33, %v1184_v26  ;;  %v1213_v12 = vmax.f32 %v1193_v53, 0.0 }
 0x228   :  { %v1947_v46 = vpop.f32.mrf.mxu1 }
 0x229   :  { %v1196_v35 = vadd.f32 %v1947_v46, %v1647_v33  ;;  %1972 = vmatprep.mubr.bf16.mxu0 %v1219_v47  ;;  %v1211_v14 = vmax.f32 %v1185_v42, 0.0 }
 0x22a   :  { %v1187_v51 = vpop.f32.mrf.mxu1  ;;  %1973 = vmatmul.mubr.bf16.gmra.mxu0 %v1220_v43 }
 0x22b   :  { %v1188_v10 = vadd.f32 %v1647_v33, %v1187_v51  ;;  %v1214_v9 = vmax.f32 %v1196_v35, 0.0 }
 0x22d   :  { %v1212_v16 = vmax.f32 %v1188_v10, 0.0  ;;  %v1222_v32 = vpack.c.bf16 %v1214_v9, %v1213_v12 }
 0x22f   :  { %v1221_v41 = vpack.c.bf16 %v1212_v16, %v1211_v14 }
 0x231   :  { %1976 = vmatprep.mubr.bf16.mxu0 %v1221_v41 }
 0x232   :  { %1977 = vmatmul.mubr.bf16.gmra.mxu0 %v1222_v32 }
 0x2d0   :  { %v1966_v56 = vpop.f32.mrf.mxu0 }
 0x2d1   :  { %v1337_v4 = vadd.f32 %v1966_v56, %v1656_v28 }
 0x2d2   :  { %v1328_v6 = vpop.f32.mrf.mxu0 }
 0x2d3   :  { %v1329_v52 = vadd.f32 %v1656_v28, %v1328_v6  ;;  %1395 = vmax.xlane.f32.xlu1 %v1337_v4 }
 0x2d4   :  { %v1967_v44 = vpop.f32.mrf.mxu0 }
 0x2d5   :  { %v1340_v30 = vadd.f32 %v1967_v44, %v1656_v28  ;;  %1391 = vmax.xlane.f32.xlu0 %v1329_v52 }
 0x2d6   :  { %v1331_v45 = vpop.f32.mrf.mxu0 }
 0x2d7   :  { %v1332_v49 = vadd.f32 %v1656_v28, %v1331_v45  ;;  %1397 = vmax.xlane.f32.xlu1 %v1340_v30 }
 0x2d9   :  { %1393 = vmax.xlane.f32.xlu0 %v1332_v49 }
 0x2da   :  { %v1970_v33 = vpop.f32.mrf.mxu0 }
 0x2db   :  { %v1353_v54 = vadd.f32 %v1970_v33, %v1656_v28 }
 0x2dc   :  { %v1344_v50 = vpop.f32.mrf.mxu0 }
 0x2dd   :  { %v1345_v48 = vadd.f32 %v1656_v28, %v1344_v50 }
 0x2de   :  { %v1971_v63 = vpop.f32.mrf.mxu0 }
 0x2df   :  { %1399 = vmax.xlane.f32.xlu0 %v1345_v48  ;;  %v1356_v60 = vadd.f32 %v1971_v63, %v1656_v28 }
 0x2e0   :  { %v1347_v2 = vpop.f32.mrf.mxu0 }
 0x2e1   :  { %v1348_v57 = vadd.f32 %v1656_v28, %v1347_v2 }
 0x2e3   :  { %1401 = vmax.xlane.f32.xlu1 %v1348_v57  ;;  %1403 = vmax.xlane.f32.xlu0 %v1353_v54 }
 0x2e7   :  { %1405 = vmax.xlane.f32.xlu1 %v1356_v60 }
 0x2ea   :  { %v1974_v55 = vpop.f32.mrf.mxu0 }
 0x2eb   :  { %v1369_v29 = vadd.f32 %v1974_v55, %v1656_v28 }
 0x2ec   :  { %v1360_v58 = vpop.f32.mrf.mxu0 }
 0x2ed   :  { %v2866_v31 = vadd.f32 %v1656_v28, %v1360_v58 }
 0x2ee   :  { %v1975_v38 = vpop.f32.mrf.mxu0 }
 0x2ef   :  { %1407 = vmax.xlane.f32.xlu0 %v2866_v31  ;;  %v2869_v25 = vadd.f32 %v1975_v38, %v1656_v28 }
 0x2f0   :  { %v1363_v27 = vpop.f32.mrf.mxu0 }
 0x2f1   :  { %v1364_v5 = vadd.f32 %v1656_v28, %v1363_v27 }
 0x2f2   :  { %v1978_v7 = vpop.f32.mrf.mxu0 }
 0x2f3   :  { %1409 = vmax.xlane.f32.xlu1 %v1364_v5  ;;  %1411 = vmax.xlane.f32.xlu0 %v1369_v29  ;;  %v2875_v18 = vadd.f32 %v1978_v7, %v1656_v28 }
 0x2f4   :  { %v1376_v23 = vpop.f32.mrf.mxu0 }
 0x2f5   :  { %v2871_v17 = vadd.f32 %v1656_v28, %v1376_v23 }
 0x2f6   :  { %v1979_v13 = vpop.f32.mrf.mxu0 }
 0x2f7   :  { %1413 = vmax.xlane.f32.xlu1 %v2869_v25  ;;  %1415 = vmax.xlane.f32.xlu0 %v2871_v17  ;;  %v2881_v22 = vadd.f32 %v1979_v13, %v1656_v28 }
 0x2f8   :  { %v1379_v15 = vpop.f32.mrf.mxu0 }
 0x2f9   :  { %v2877_v20 = vadd.f32 %v1656_v28, %v1379_v15 }
 0x2fb   :  { %1417 = vmax.xlane.f32.xlu1 %v2877_v20  ;;  %1419 = vmax.xlane.f32.xlu0 %v2875_v18 }
 0x2ff   :  { %1421 = vmax.xlane.f32.xlu1 %v2881_v22 }
 0x35c   :  { %v1396_v0 = vpop.xlane.xlu1 %1395 }
 0x35d   :  { %v2884_v3 = vsub.f32 %v1337_v4, %v1396_v0 }
 0x35e   :  { %v1392_v24 = vpop.xlane.xlu0 %1391 }
 0x35f   :  { %v1443_v8 = vmul.f32 1.442695, %v2884_v3  ;;  %v2887_v11 = vsub.f32 %v1329_v52, %v1392_v24 }
 0x360   :  { %v1398_v19 = vpop.xlane.xlu1 %1397 }
 0x361   :  { %2061 = vpow2.f32 %v1443_v8  ;;  %v1439_v21 = vmul.f32 1.442695, %v2887_v11  ;;  %v2890_v59 = vsub.f32 %v1340_v30, %v1398_v19 }
 0x362   :  { %v1394_v36 = vpop.xlane.xlu0 %1393 }
 0x363   :  { %v2892_v62 = vsub.f32 %v1332_v49, %v1394_v36  ;;  %2063 = vpow2.f32 %v1439_v21  ;;  %v1445_v34 = vmul.f32 1.442695, %v2890_v59 }
 0x365   :  { %v1441_v61 = vmul.f32 1.442695, %v2892_v62 }
 0x367   :  { %2065 = vpow2.f32 %v1441_v61 }
 0x368   :  { %v1400_v1 = vpop.xlane.xlu0 %1399  ;;  %2067 = vpow2.f32 %v1445_v34 }
 0x369   :  { %v2900_v43 = vsub.f32 %v1345_v48, %v1400_v1 }
 0x36b   :  { %v1447_v10 = vmul.f32 1.442695, %v2900_v43 }
 0x36c   :  { %v1402_v37 = vpop.xlane.xlu1 %1401  ;;  %v1404_v39 = vpop.xlane.xlu0 %1403 }
 0x36d   :  { %v2896_v40 = vsub.f32 %v1348_v57, %v1402_v37  ;;  %v2898_v26 = vsub.f32 %v1353_v54, %v1404_v39 }
 0x36e   :  { %v2062_v47 = vpop.eup %2061 }
 0x36f   :  { %v1449_v46 = vmul.f32 1.442695, %v2896_v40  ;;  %v1451_v42 = vmul.f32 1.442695, %v2898_v26  ;;  %1475 = vadd.xlane.f32.xlu0 %v2062_v47 }
 0x370   :  { %v1406_v35 = vpop.xlane.xlu1 %1405  ;;  %v2064_v51 = vpop.eup %2063 }
 0x371   :  { %2069 = vpow2.f32 %v1449_v46  ;;  %v2904_v53 = vsub.f32 %v1356_v60, %v1406_v35 }
 0x372   :  { %2071 = vpow2.f32 %v1451_v42 }
 0x373   :  { %v1453_v9 = vmul.f32 1.442695, %v2904_v53  ;;  %1471 = vadd.xlane.f32.xlu0 %v2064_v51 }
 0x374   :  { %v2066_v14 = vpop.eup %2065 }
 0x375   :  { %2073 = vpow2.f32 %v1453_v9  ;;  %1473 = vadd.xlane.f32.xlu1 %v2066_v14  ;;  %v2068_v16 = vpop.eup %2067 }
 0x376   :  { %2075 = vpow2.f32 %v1447_v10 }
 0x378   :  { %v1408_v12 = vpop.xlane.xlu0 %1407 }
 0x379   :  { %1477 = vadd.xlane.f32.xlu1 %v2068_v16  ;;  %v2913_v6 = vsub.f32 %v2866_v31, %v1408_v12 }
 0x37b   :  { %v1455_v48 = vmul.f32 1.442695, %v2913_v6 }
 0x37c   :  { %v1410_v41 = vpop.xlane.xlu1 %1409  ;;  %v1412_v32 = vpop.xlane.xlu0 %1411 }
 0x37d   :  { %v2908_v28 = vsub.f32 %v1364_v5, %v1410_v41  ;;  %v2910_v56 = vsub.f32 %v1369_v29, %v1412_v32 }
 0x37e   :  { %v2070_v4 = vpop.eup %2069 }
 0x37f   :  { %v2072_v52 = vpop.eup %2071  ;;  %v1457_v44 = vmul.f32 1.442695, %v2908_v28  ;;  %v1459_v30 = vmul.f32 1.442695, %v2910_v56  ;;  %1481 = vadd.xlane.f32.xlu1 %v2070_v4 }
 0x380   :  { %1483 = vadd.xlane.f32.xlu0 %v2072_v52  ;;  %v1414_v45 = vpop.xlane.xlu1 %1413  ;;  %v1416_v49 = vpop.xlane.xlu0 %1415 }
 0x381   :  { %2077 = vpow2.f32 %v1457_v44  ;;  %v2918_v33 = vsub.f32 %v2869_v25, %v1414_v45  ;;  %v2929_v58 = vsub.f32 %v2871_v17, %v1416_v49 }
 0x382   :  { %v2074_v50 = vpop.eup %2073  ;;  %2079 = vpow2.f32 %v1459_v30 }
 0x383   :  { %v2076_v63 = vpop.eup %2075  ;;  %v1461_v2 = vmul.f32 1.442695, %v2918_v33  ;;  %1485 = vadd.xlane.f32.xlu1 %v2074_v50  ;;  %v1463_v5 = vmul.f32 1.442695, %v2929_v58 }
 0x384   :  { %1479 = vadd.xlane.f32.xlu0 %v2076_v63  ;;  %v1418_v54 = vpop.xlane.xlu1 %1417  ;;  %v1420_v57 = vpop.xlane.xlu0 %1419 }
 0x385   :  { %2081 = vpow2.f32 %v1461_v2  ;;  %v2923_v60 = vsub.f32 %v2877_v20, %v1418_v54  ;;  %v2926_v55 = vsub.f32 %v2875_v18, %v1420_v57 }
 0x386   :  { %2083 = vpow2.f32 %v1455_v48 }
 0x387   :  { %v1465_v31 = vmul.f32 1.442695, %v2923_v60  ;;  %v1467_v38 = vmul.f32 1.442695, %v2926_v55 }
 0x388   :  { %v1422_v27 = vpop.xlane.xlu1 %1421 }
 0x389   :  { %2085 = vpow2.f32 %v1465_v31  ;;  %v2934_v29 = vsub.f32 %v2881_v22, %v1422_v27 }
 0x38a   :  { %2087 = vpow2.f32 %v1467_v38 }
 0x38b   :  { %v1469_v7 = vmul.f32 1.442695, %v2934_v29 }
 0x38d   :  { %2089 = vpow2.f32 %v1469_v7 }
 0x38e   :  { %v2078_v23 = vpop.eup %2077  ;;  %2091 = vpow2.f32 %v1463_v5 }
 0x38f   :  { %v2080_v25 = vpop.eup %2079  ;;  %1489 = vadd.xlane.f32.xlu1 %v2078_v23 }
 0x390   :  { %1491 = vadd.xlane.f32.xlu0 %v2080_v25 }
 0x392   :  { %v2082_v17 = vpop.eup %2081 }
 0x393   :  { %v2084_v13 = vpop.eup %2083  ;;  %1493 = vadd.xlane.f32.xlu1 %v2082_v17 }
 0x394   :  { %1487 = vadd.xlane.f32.xlu0 %v2084_v13 }
 0x396   :  { %v2086_v15 = vpop.eup %2085 }
 0x397   :  { %v2088_v18 = vpop.eup %2087  ;;  %1497 = vadd.xlane.f32.xlu1 %v2086_v15 }
 0x398   :  { %1499 = vadd.xlane.f32.xlu0 %v2088_v18 }
 0x39a   :  { %v2090_v20 = vpop.eup %2089 }
 0x39b   :  { %v2092_v22 = vpop.eup %2091  ;;  %1501 = vadd.xlane.f32.xlu1 %v2090_v20 }
 0x39c   :  { %1495 = vadd.xlane.f32.xlu0 %v2092_v22 }
 0x3f8   :  { %v1476_v0 = vpop.xlane.xlu0 %1475 }
 0x3fc   :  { %v1472_v24 = vpop.xlane.xlu0 %1471 }
 0x3fd   :  { %2093 = vlog2.f32 %v1472_v24 }
 0x3fe   :  { %v1474_v8 = vpop.xlane.xlu1 %1473 }
 0x3ff   :  { %2095 = vlog2.f32 %v1474_v8 }
 0x400   :  { %2097 = vlog2.f32 %v1476_v0 }
 0x402   :  { %v1478_v19 = vpop.xlane.xlu1 %1477 }
 0x403   :  { %2099 = vlog2.f32 %v1478_v19 }
 0x408   :  { %v1482_v61 = vpop.xlane.xlu1 %1481 }
 0x409   :  { %v1484_v21 = vpop.xlane.xlu0 %1483  ;;  %2101 = vlog2.f32 %v1482_v61 }
 0x40a   :  { %v2094_v36 = vpop.eup %2093 }
 0x40b   :  { %v1504_v34 = vmul.f32 0.6931472, %v2094_v36 }
 0x40c   :  { %v2096_v1 = vpop.eup %2095  ;;  %v1486_v10 = vpop.xlane.xlu1 %1485 }
 0x40d   :  { %v1506_v37 = vmul.f32 0.6931472, %v2096_v1  ;;  %v1480_v39 = vpop.xlane.xlu0 %1479  ;;  %v1535_v47 = vsub.f32 %v2887_v11, %v1504_v34  ;;  %v2098_v46 = vpop.eup %2097 }
 0x40e   :  { %2103 = vlog2.f32 %v1480_v39  ;;  %v1508_v42 = vmul.f32 0.6931472, %v2098_v46 }
 0x40f   :  { %1551 = vxpose.xlu0.b32.start [1/16] (narrow) %v1535_v47, 16  ;;  %v1536_v35 = vsub.f32 %v2892_v62, %v1506_v37  ;;  %2105 = vlog2.f32 %v1484_v21 }
 0x410   :  { %v2100_v51 = vpop.eup %2099  ;;  %v1537_v14 = vsub.f32 %v2884_v3, %v1508_v42  ;;  %2107 = vlog2.f32 %v1486_v10 }
 0x411   :  { %v1510_v9 = vmul.f32 0.6931472, %v2100_v51 }
 0x413   :  { %1552 = vxpose.xlu0.b32.cont [2/16] (narrow) %v1536_v35, 16  ;;  %v1538_v12 = vsub.f32 %v2890_v59, %v1510_v9 }
 0x416   :  { %v2102_v41 = vpop.eup %2101 }
 0x417   :  { %1553 = vxpose.xlu0.b32.cont [3/16] (narrow) %v1537_v14, 16  ;;  %v1514_v62 = vmul.f32 0.6931472, %v2102_v41 }
 0x418   :  { %v1490_v11 = vpop.xlane.xlu1 %1489 }
 0x419   :  { %v1492_v16 = vpop.xlane.xlu0 %1491  ;;  %2109 = vlog2.f32 %v1490_v11  ;;  %v1540_v49 = vsub.f32 %v2896_v40, %v1514_v62 }
 0x41b   :  { %v2104_v32 = vpop.eup %2103  ;;  %1554 = vxpose.xlu0.b32.cont [4/16] (narrow) %v1538_v12, 16 }
 0x41c   :  { %v1512_v4 = vmul.f32 0.6931472, %v2104_v32  ;;  %v2106_v30 = vpop.eup %2105  ;;  %v1494_v59 = vpop.xlane.xlu1 %1493 }
 0x41d   :  { %v1488_v52 = vpop.xlane.xlu0 %1487  ;;  %v1516_v3 = vmul.f32 0.6931472, %v2106_v30  ;;  %v2108_v50 = vpop.eup %2107 }
 0x41e   :  { %2111 = vlog2.f32 %v1488_v52  ;;  %v1539_v44 = vsub.f32 %v2900_v43, %v1512_v4  ;;  %v1518_v48 = vmul.f32 0.6931472, %v2108_v50 }
 0x41f   :  { %2113 = vlog2.f32 %v1492_v16  ;;  %v1541_v63 = vsub.f32 %v2898_v26, %v1516_v3 }
 0x420   :  { %1555 = vxpose.xlu0.b32.cont [5/16] (narrow) %v1539_v44, 16  ;;  %2115 = vlog2.f32 %v1494_v59  ;;  %v1542_v43 = vsub.f32 %v2904_v53, %v1518_v48  ;;  %v1498_v31 = vpop.xlane.xlu1 %1497 }
 0x421   :  { %v1500_v45 = vpop.xlane.xlu0 %1499 }
 0x424   :  { %1556 = vxpose.xlu0.b32.cont [6/16] (narrow) %v1540_v49, 16  ;;  %v1502_v25 = vpop.xlane.xlu1 %1501 }
 0x425   :  { %v1496_v2 = vpop.xlane.xlu0 %1495 }
 0x426   :  { %v2110_v54 = vpop.eup %2109  ;;  %2117 = vlog2.f32 %v1496_v2 }
 0x427   :  { %v1522_v27 = vmul.f32 0.6931472, %v2110_v54  ;;  %2119 = vlog2.f32 %v1498_v31 }
 0x428   :  { %1557 = vxpose.xlu0.b32.cont [7/16] (narrow) %v1541_v63, 16  ;;  %2121 = vlog2.f32 %v1500_v45 }
 0x429   :  { %v1544_v26 = vsub.f32 %v2908_v28, %v1522_v27  ;;  %2123 = vlog2.f32 %v1502_v25 }
 0x42b   :  { %v2112_v57 = vpop.eup %2111 }
 0x42c   :  { %v1520_v38 = vmul.f32 0.6931472, %v2112_v57  ;;  %1558 = vxpose.xlu0.b32.cont [8/16] (narrow) %v1542_v43, 16  ;;  %v2114_v5 = vpop.eup %2113 }
 0x42d   :  { %v1524_v7 = vmul.f32 0.6931472, %v2114_v5  ;;  %v2116_v23 = vpop.eup %2115 }
 0x42e   :  { %v1543_v40 = vsub.f32 %v2913_v6, %v1520_v38  ;;  %v1526_v17 = vmul.f32 0.6931472, %v2116_v23 }
 0x42f   :  { %v1545_v53 = vsub.f32 %v2910_v56, %v1524_v7 }
 0x430   :  { %1559 = vxpose.xlu0.b32.cont [9/16] (narrow) %v1543_v40, 16  ;;  %v1546_v18 = vsub.f32 %v2918_v33, %v1526_v17 }
 0x433   :  { %v2118_v13 = vpop.eup %2117 }
 0x434   :  { %1560 = vxpose.xlu0.b32.cont [10/16] (narrow) %v1544_v26, 16  ;;  %v1528_v15 = vmul.f32 0.6931472, %v2118_v13  ;;  %v2120_v20 = vpop.eup %2119 }
 0x435   :  { %v1530_v6 = vmul.f32 0.6931472, %v2120_v20  ;;  %v2122_v0 = vpop.eup %2121 }
 0x436   :  { %v1547_v22 = vsub.f32 %v2929_v58, %v1528_v15  ;;  %v1532_v28 = vmul.f32 0.6931472, %v2122_v0  ;;  %v2124_v8 = vpop.eup %2123 }
 0x437   :  { %v1548_v24 = vsub.f32 %v2923_v60, %v1530_v6  ;;  %v1534_v19 = vmul.f32 0.6931472, %v2124_v8 }
 0x438   :  { %1561 = vxpose.xlu0.b32.cont [11/16] (narrow) %v1545_v53, 16  ;;  %v1549_v56 = vsub.f32 %v2926_v55, %v1532_v28 }
 0x439   :  { %v1550_v21 = vsub.f32 %v2934_v29, %v1534_v19 }
 0x43c   :  { %1562 = vxpose.xlu0.b32.cont [12/16] (narrow) %v1546_v18, 16 }
 0x440   :  { %1563 = vxpose.xlu0.b32.cont [13/16] (narrow) %v1547_v22, 16 }
 0x444   :  { %1564 = vxpose.xlu0.b32.cont [14/16] (narrow) %v1548_v24, 16 }
 0x448   :  { %1565 = vxpose.xlu0.b32.cont [15/16] (narrow) %v1549_v56, 16 }
 0x44c   :  { %1566 = vxpose.xlu0.b32.end [16/16] (narrow) %v1550_v21, 16 }
 0x48c   :  { %v1567_v33 = vpop.trf.xlu0 }
 0x48d   :  { %1583 = vst [vmem:[%s2967_s7] sm:$0xff] %v1567_v33 }
 0x490   :  { %v1568_v58 = vpop.trf.xlu0 }
 0x491   :  { %1584 = vst [vmem:[%s2967_s7 + $0x8] sm:$0xff] %v1568_v58 }

</bundles_post_ra>
